<compile_context>
chip_gen: v6e
topology: v6e:2x2x1
jax: 0.10.0
libtpu: 0.0.40
codegen_flags: <defaults>
</compile_context>

<pallas_src>
import jax
import jax.numpy as jnp
from jax.experimental import pallas as pl
from jax.experimental.pallas import tpu as pltpu

I_DIM = 45      # LSTM input size
I_PAD = 128     # lane-dense padded input width
H_DIM = 128     # LSTM hidden size
O_DIM = 45      # fc output size
O_PAD = 128     # lane-dense fc output width
SUBLANE = 8     # f32 sublane tile


def lotto_lstm_kernel(x_ref, wih_ref, whh_ref, b_ref, wfc_ref, bfc_ref,
                      out_ref, pre_ref):
    """Single-invocation LSTM + fc + sigmoid.

    x_ref  : (T*B_pad, I_PAD)  time-major rows (row = t*B_pad + b), f32
    wih_ref: (I_PAD, 4H)  Wih^T (gate order [i,f,o,g], zero rows past I_DIM)
    whh_ref: (H, 4H)      Whh^T (gate order [i,f,o,g])
    b_ref  : (1, 4H)      b_ih + b_hh (gate order [i,f,o,g])
    wfc_ref: (H, O_PAD)   Wfc^T zero-padded     bfc_ref: (1, O_PAD)
    out_ref: (B_pad, O_PAD)
    pre_ref: (T*B_pad, 4H) VMEM scratch for the hoisted input projection
    """
    TB = x_ref.shape[0]
    B = out_ref.shape[0]
    T = TB // B

    # ---- hoisted input projection for all timesteps, staged in VMEM scratch ----
    pre_ref[...] = (jnp.dot(x_ref[...], wih_ref[...],
                            preferred_element_type=jnp.float32)
                    + b_ref[...])                              # (T*B, 4H)

    h = jnp.zeros((B, H_DIM), jnp.float32)
    c = jnp.zeros((B, H_DIM), jnp.float32)

    # T is small & static -> fully unrolled serial recurrence (single launch).
    for t in range(T):
        # static slice of the scratch (4 vregs) + one MXU push per step;
        # Whh is re-read from VMEM each step so it never occupies 64 vregs.
        gates = pre_ref[t * B:(t + 1) * B, :] + jnp.dot(
            h, whh_ref[...], preferred_element_type=jnp.float32)   # (B, 4H)
        sig = jax.nn.sigmoid(gates[:, :3 * H_DIM])   # [i | f | o] in one EUP pass
        g_g = jnp.tanh(gates[:, 3 * H_DIM:])
        i_g = sig[:, 0 * H_DIM:1 * H_DIM]
        f_g = sig[:, 1 * H_DIM:2 * H_DIM]
        o_g = sig[:, 2 * H_DIM:3 * H_DIM]
        c = f_g * c + i_g * g_g
        h = o_g * jnp.tanh(c)

    # ---- fused final Linear + sigmoid, lane-dense (B_pad, 128) output ----
    logits = (jnp.dot(h, wfc_ref[...], preferred_element_type=jnp.float32)
              + bfc_ref[...])
    out_ref[...] = jax.nn.sigmoid(logits)


def prepare_params(params):
    """One-time weight layout: transpose, gate-permute ([i,f,g,o]->[i,f,o,g]),
    pad to lane-dense widths, and pre-sum the biases. Called outside jit."""
    H = H_DIM
    perm = jnp.concatenate([jnp.arange(0, H),          # i
                            jnp.arange(H, 2 * H),      # f
                            jnp.arange(3 * H, 4 * H),  # o
                            jnp.arange(2 * H, 3 * H)]) # g
    w_ih = params["w_ih"][perm].astype(jnp.float32)    # (4H, I)
    w_hh = params["w_hh"][perm].astype(jnp.float32)    # (4H, H)
    b_sum = (params["b_ih"] + params["b_hh"])[perm].astype(jnp.float32)

    wih_t = jnp.zeros((I_PAD, 4 * H), jnp.float32).at[:I_DIM, :].set(w_ih.T)
    whh_t = w_hh.T                                      # (H, 4H)
    bias = b_sum.reshape(1, 4 * H)
    wfc_t = jnp.zeros((H_DIM, O_PAD), jnp.float32).at[:, :O_DIM].set(
        params["w_fc"].T.astype(jnp.float32))
    bfc = jnp.zeros((1, O_PAD), jnp.float32).at[:, :O_DIM].set(
        params["b_fc"].astype(jnp.float32))
    return {"wih_t": wih_t, "whh_t": whh_t, "bias": bias,
            "wfc_t": wfc_t, "bfc": bfc}


def lotto_model_forward(x_btI, prep):
    """x_btI: (B, T, 45) float32 (PyTorch batch_first layout). prep: prepare_params()."""
    B, T, _ = x_btI.shape
    B_pad = max(SUBLANE, ((B + SUBLANE - 1) // SUBLANE) * SUBLANE)

    # One small XLA fusion: time-major + pad batch/features + flatten.
    x_tb = jnp.transpose(x_btI.astype(jnp.float32), (1, 0, 2))        # (T, B, I)
    x_tb = jnp.pad(x_tb, ((0, 0), (0, B_pad - B), (0, I_PAD - I_DIM)))
    x2d = x_tb.reshape(T * B_pad, I_PAD)

    vmem_spec = pl.BlockSpec(memory_space=pltpu.MemorySpace.VMEM)
    out_pad = pl.pallas_call(
        lotto_lstm_kernel,
        out_shape=jax.ShapeDtypeStruct((B_pad, O_PAD), jnp.float32),
        in_specs=[vmem_spec] * 6,
        out_specs=vmem_spec,
        scratch_shapes=[pltpu.VMEM((T * B_pad, 4 * H_DIM), jnp.float32)],
    )(x2d, prep["wih_t"], prep["whh_t"], prep["bias"],
      prep["wfc_t"], prep["bfc"])

    # Drop padded batch rows / padded output lanes (padded data never escapes).
    return out_pad[:B, :O_DIM]


def make_params(key):
    ks = jax.random.split(key, 6)
    scale = 0.1
    return {
        "w_ih": scale * jax.random.normal(ks[0], (4 * H_DIM, I_DIM), jnp.float32),
        "w_hh": scale * jax.random.normal(ks[1], (4 * H_DIM, H_DIM), jnp.float32),
        "b_ih": scale * jax.random.normal(ks[2], (4 * H_DIM,), jnp.float32),
        "b_hh": scale * jax.random.normal(ks[3], (4 * H_DIM,), jnp.float32),
        "w_fc": scale * jax.random.normal(ks[4], (O_DIM, H_DIM), jnp.float32),
        "b_fc": scale * jax.random.normal(ks[5], (O_DIM,), jnp.float32),
    }


def reference_forward(x_btI, params):
    """Pure-JAX reference matching PyTorch LSTM (gate order i,f,g,o) + Linear + sigmoid."""
    B, T, _ = x_btI.shape
    h = jnp.zeros((B, H_DIM), jnp.float32)
    c = jnp.zeros((B, H_DIM), jnp.float32)
    for t in range(T):
        x_t = x_btI[:, t, :]
        gates = (x_t @ params["w_ih"].T + params["b_ih"]
                 + h @ params["w_hh"].T + params["b_hh"])
        i_g = jax.nn.sigmoid(gates[:, 0 * H_DIM:1 * H_DIM])
        f_g = jax.nn.sigmoid(gates[:, 1 * H_DIM:2 * H_DIM])
        g_g = jnp.tanh(gates[:, 2 * H_DIM:3 * H_DIM])
        o_g = jax.nn.sigmoid(gates[:, 3 * H_DIM:4 * H_DIM])
        c = f_g * c + i_g * g_g
        h = o_g * jnp.tanh(c)
    return jax.nn.sigmoid(h @ params["w_fc"].T + params["b_fc"])


if __name__ == "__main__":
    key = jax.random.PRNGKey(0)
    k_x, k_p = jax.random.split(key)

    B, T = 2, 8
    # multi-hot style lotto history rows (values in [0, 1])
    x = jax.random.uniform(k_x, (B, T, I_DIM), jnp.float32)
    params = make_params(k_p)
    prep = jax.tree_util.tree_map(jax.device_put, prepare_params(params))

    fwd = jax.jit(lotto_model_forward)
    out = jax.block_until_ready(fwd(x, prep))
    assert out.shape == (B, O_DIM) and out.dtype == jnp.float32

    ref = reference_forward(x, params)
    assert jnp.allclose(out, ref, atol=1e-4, rtol=1e-4), "mismatch vs reference"

    print("KERNEL_OK")
</pallas_src>

<mosaic_0001>
module attributes {stable_mosaic.version = 11 : i64} {
  func.func @lotto_lstm_kernel(%arg0: memref<64x128xf32, #tpu.memory_space<vmem>>, %arg1: memref<128x512xf32, #tpu.memory_space<vmem>>, %arg2: memref<128x512xf32, #tpu.memory_space<vmem>>, %arg3: memref<1x512xf32, #tpu.memory_space<vmem>>, %arg4: memref<128x128xf32, #tpu.memory_space<vmem>>, %arg5: memref<1x128xf32, #tpu.memory_space<vmem>>, %arg6: memref<8x128xf32, #tpu.memory_space<vmem>>, %arg7: memref<64x512xf32, #tpu.memory_space<vmem>>) attributes {dimension_semantics = [], scalar_prefetch = 0 : i64, scratch_operands = 1 : i64, tpu.core_type = #tpu.core_type<tc>} {
    %c0 = arith.constant 0 : index
    %c0_0 = arith.constant 0 : index
    %0 = vector.load %arg0[%c0, %c0_0] : memref<64x128xf32, #tpu.memory_space<vmem>>, vector<64x128xf32>
    %c0_1 = arith.constant 0 : index
    %c0_2 = arith.constant 0 : index
    %1 = vector.load %arg1[%c0_1, %c0_2] : memref<128x512xf32, #tpu.memory_space<vmem>>, vector<128x512xf32>
    %cst = arith.constant dense<0.000000e+00> : vector<64x512xf32>
    %2 = tpu.matmul %0, %1, %cst {dimension_numbers = #tpu.dot_dimension_numbers<[1], [0], [0], [1], [0, 0, 1, 1], [], []>} : vector<64x128xf32>, vector<128x512xf32>, vector<64x512xf32> -> vector<64x512xf32>
    %c0_3 = arith.constant 0 : index
    %c0_4 = arith.constant 0 : index
    %3 = vector.load %arg3[%c0_3, %c0_4] : memref<1x512xf32, #tpu.memory_space<vmem>>, vector<1x512xf32>
    %4 = vector.broadcast %3 : vector<1x512xf32> to vector<64x512xf32>
    %5 = arith.addf %2, %4 : vector<64x512xf32>
    %c0_5 = arith.constant 0 : index
    %c0_6 = arith.constant 0 : index
    %6 = vector.load %arg7[%c0_5, %c0_6] : memref<64x512xf32, #tpu.memory_space<vmem>>, vector<64x512xf32>
    tpu.vector_store %arg7[%c0_5, %c0_6], %5 {strides = array<i32>} : memref<64x512xf32, #tpu.memory_space<vmem>>, vector<64x512xf32>,
    %cst_7 = arith.constant 0.000000e+00 : f32
    %7 = vector.broadcast %cst_7 : f32 to vector<8x128xf32>
    %cst_8 = arith.constant 0.000000e+00 : f32
    %8 = vector.broadcast %cst_8 : f32 to vector<8x128xf32>
    %c0_9 = arith.constant 0 : index
    %c0_10 = arith.constant 0 : index
    %9 = vector.load %arg7[%c0_9, %c0_10] : memref<64x512xf32, #tpu.memory_space<vmem>>, vector<8x512xf32>
    %c0_11 = arith.constant 0 : index
    %c0_12 = arith.constant 0 : index
    %10 = vector.load %arg2[%c0_11, %c0_12] : memref<128x512xf32, #tpu.memory_space<vmem>>, vector<128x512xf32>
    %cst_13 = arith.constant dense<0.000000e+00> : vector<8x512xf32>
    %11 = tpu.matmul %7, %10, %cst_13 {dimension_numbers = #tpu.dot_dimension_numbers<[1], [0], [0], [1], [0, 0, 1, 1], [], []>} : vector<8x128xf32>, vector<128x512xf32>, vector<8x512xf32> -> vector<8x512xf32>
    %12 = arith.addf %9, %11 : vector<8x512xf32>
    %13 = vector.extract_strided_slice %12 {offsets = [0, 0], sizes = [8, 384], strides = [1, 1]} : vector<8x512xf32> to vector<8x384xf32>
    %14 = arith.negf %13 : vector<8x384xf32>
    %15 = math.exp %14 : vector<8x384xf32>
    %cst_14 = arith.constant 1.000000e+00 : f32
    %16 = vector.broadcast %cst_14 : f32 to vector<8x384xf32>
    %17 = arith.addf %16, %15 : vector<8x384xf32>
    %18 = arith.divf %16, %17 : vector<8x384xf32>
    %19 = vector.extract_strided_slice %12 {offsets = [0, 384], sizes = [8, 128], strides = [1, 1]} : vector<8x512xf32> to vector<8x128xf32>
    %20 = math.tanh %19 : vector<8x128xf32>
    %21 = vector.extract_strided_slice %18 {offsets = [0, 0], sizes = [8, 128], strides = [1, 1]} : vector<8x384xf32> to vector<8x128xf32>
    %22 = vector.extract_strided_slice %18 {offsets = [0, 128], sizes = [8, 128], strides = [1, 1]} : vector<8x384xf32> to vector<8x128xf32>
    %23 = vector.extract_strided_slice %18 {offsets = [0, 256], sizes = [8, 128], strides = [1, 1]} : vector<8x384xf32> to vector<8x128xf32>
    %24 = arith.mulf %22, %8 : vector<8x128xf32>
    %25 = arith.mulf %21, %20 : vector<8x128xf32>
    %26 = arith.addf %24, %25 : vector<8x128xf32>
    %27 = math.tanh %26 : vector<8x128xf32>
    %28 = arith.mulf %23, %27 : vector<8x128xf32>
    %c8 = arith.constant 8 : index
    %c0_15 = arith.constant 0 : index
    %29 = vector.load %arg7[%c8, %c0_15] : memref<64x512xf32, #tpu.memory_space<vmem>>, vector<8x512xf32>
    %c0_16 = arith.constant 0 : index
    %c0_17 = arith.constant 0 : index
    %30 = vector.load %arg2[%c0_16, %c0_17] : memref<128x512xf32, #tpu.memory_space<vmem>>, vector<128x512xf32>
    %cst_18 = arith.constant dense<0.000000e+00> : vector<8x512xf32>
    %31 = tpu.matmul %28, %30, %cst_18 {dimension_numbers = #tpu.dot_dimension_numbers<[1], [0], [0], [1], [0, 0, 1, 1], [], []>} : vector<8x128xf32>, vector<128x512xf32>, vector<8x512xf32> -> vector<8x512xf32>
    %32 = arith.addf %29, %31 : vector<8x512xf32>
    %33 = vector.extract_strided_slice %32 {offsets = [0, 0], sizes = [8, 384], strides = [1, 1]} : vector<8x512xf32> to vector<8x384xf32>
    %34 = arith.negf %33 : vector<8x384xf32>
    %35 = math.exp %34 : vector<8x384xf32>
    %cst_19 = arith.constant 1.000000e+00 : f32
    %36 = vector.broadcast %cst_19 : f32 to vector<8x384xf32>
    %37 = arith.addf %36, %35 : vector<8x384xf32>
    %38 = arith.divf %36, %37 : vector<8x384xf32>
    %39 = vector.extract_strided_slice %32 {offsets = [0, 384], sizes = [8, 128], strides = [1, 1]} : vector<8x512xf32> to vector<8x128xf32>
    %40 = math.tanh %39 : vector<8x128xf32>
    %41 = vector.extract_strided_slice %38 {offsets = [0, 0], sizes = [8, 128], strides = [1, 1]} : vector<8x384xf32> to vector<8x128xf32>
    %42 = vector.extract_strided_slice %38 {offsets = [0, 128], sizes = [8, 128], strides = [1, 1]} : vector<8x384xf32> to vector<8x128xf32>
    %43 = vector.extract_strided_slice %38 {offsets = [0, 256], sizes = [8, 128], strides = [1, 1]} : vector<8x384xf32> to vector<8x128xf32>
    %44 = arith.mulf %42, %26 : vector<8x128xf32>
    %45 = arith.mulf %41, %40 : vector<8x128xf32>
    %46 = arith.addf %44, %45 : vector<8x128xf32>
    %47 = math.tanh %46 : vector<8x128xf32>
    %48 = arith.mulf %43, %47 : vector<8x128xf32>
    %c16 = arith.constant 16 : index
    %c0_20 = arith.constant 0 : index
    %49 = vector.load %arg7[%c16, %c0_20] : memref<64x512xf32, #tpu.memory_space<vmem>>, vector<8x512xf32>
    %c0_21 = arith.constant 0 : index
    %c0_22 = arith.constant 0 : index
    %50 = vector.load %arg2[%c0_21, %c0_22] : memref<128x512xf32, #tpu.memory_space<vmem>>, vector<128x512xf32>
    %cst_23 = arith.constant dense<0.000000e+00> : vector<8x512xf32>
    %51 = tpu.matmul %48, %50, %cst_23 {dimension_numbers = #tpu.dot_dimension_numbers<[1], [0], [0], [1], [0, 0, 1, 1], [], []>} : vector<8x128xf32>, vector<128x512xf32>, vector<8x512xf32> -> vector<8x512xf32>
    %52 = arith.addf %49, %51 : vector<8x512xf32>
    %53 = vector.extract_strided_slice %52 {offsets = [0, 0], sizes = [8, 384], strides = [1, 1]} : vector<8x512xf32> to vector<8x384xf32>
    %54 = arith.negf %53 : vector<8x384xf32>
    %55 = math.exp %54 : vector<8x384xf32>
    %cst_24 = arith.constant 1.000000e+00 : f32
    %56 = vector.broadcast %cst_24 : f32 to vector<8x384xf32>
    %57 = arith.addf %56, %55 : vector<8x384xf32>
    %58 = arith.divf %56, %57 : vector<8x384xf32>
    %59 = vector.extract_strided_slice %52 {offsets = [0, 384], sizes = [8, 128], strides = [1, 1]} : vector<8x512xf32> to vector<8x128xf32>
    %60 = math.tanh %59 : vector<8x128xf32>
    %61 = vector.extract_strided_slice %58 {offsets = [0, 0], sizes = [8, 128], strides = [1, 1]} : vector<8x384xf32> to vector<8x128xf32>
    %62 = vector.extract_strided_slice %58 {offsets = [0, 128], sizes = [8, 128], strides = [1, 1]} : vector<8x384xf32> to vector<8x128xf32>
    %63 = vector.extract_strided_slice %58 {offsets = [0, 256], sizes = [8, 128], strides = [1, 1]} : vector<8x384xf32> to vector<8x128xf32>
    %64 = arith.mulf %62, %46 : vector<8x128xf32>
    %65 = arith.mulf %61, %60 : vector<8x128xf32>
    %66 = arith.addf %64, %65 : vector<8x128xf32>
    %67 = math.tanh %66 : vector<8x128xf32>
    %68 = arith.mulf %63, %67 : vector<8x128xf32>
    %c24 = arith.constant 24 : index
    %c0_25 = arith.constant 0 : index
    %69 = vector.load %arg7[%c24, %c0_25] : memref<64x512xf32, #tpu.memory_space<vmem>>, vector<8x512xf32>
    %c0_26 = arith.constant 0 : index
    %c0_27 = arith.constant 0 : index
    %70 = vector.load %arg2[%c0_26, %c0_27] : memref<128x512xf32, #tpu.memory_space<vmem>>, vector<128x512xf32>
    %cst_28 = arith.constant dense<0.000000e+00> : vector<8x512xf32>
    %71 = tpu.matmul %68, %70, %cst_28 {dimension_numbers = #tpu.dot_dimension_numbers<[1], [0], [0], [1], [0, 0, 1, 1], [], []>} : vector<8x128xf32>, vector<128x512xf32>, vector<8x512xf32> -> vector<8x512xf32>
    %72 = arith.addf %69, %71 : vector<8x512xf32>
    %73 = vector.extract_strided_slice %72 {offsets = [0, 0], sizes = [8, 384], strides = [1, 1]} : vector<8x512xf32> to vector<8x384xf32>
    %74 = arith.negf %73 : vector<8x384xf32>
    %75 = math.exp %74 : vector<8x384xf32>
    %cst_29 = arith.constant 1.000000e+00 : f32
    %76 = vector.broadcast %cst_29 : f32 to vector<8x384xf32>
    %77 = arith.addf %76, %75 : vector<8x384xf32>
    %78 = arith.divf %76, %77 : vector<8x384xf32>
    %79 = vector.extract_strided_slice %72 {offsets = [0, 384], sizes = [8, 128], strides = [1, 1]} : vector<8x512xf32> to vector<8x128xf32>
    %80 = math.tanh %79 : vector<8x128xf32>
    %81 = vector.extract_strided_slice %78 {offsets = [0, 0], sizes = [8, 128], strides = [1, 1]} : vector<8x384xf32> to vector<8x128xf32>
    %82 = vector.extract_strided_slice %78 {offsets = [0, 128], sizes = [8, 128], strides = [1, 1]} : vector<8x384xf32> to vector<8x128xf32>
    %83 = vector.extract_strided_slice %78 {offsets = [0, 256], sizes = [8, 128], strides = [1, 1]} : vector<8x384xf32> to vector<8x128xf32>
    %84 = arith.mulf %82, %66 : vector<8x128xf32>
    %85 = arith.mulf %81, %80 : vector<8x128xf32>
    %86 = arith.addf %84, %85 : vector<8x128xf32>
    %87 = math.tanh %86 : vector<8x128xf32>
    %88 = arith.mulf %83, %87 : vector<8x128xf32>
    %c32 = arith.constant 32 : index
    %c0_30 = arith.constant 0 : index
    %89 = vector.load %arg7[%c32, %c0_30] : memref<64x512xf32, #tpu.memory_space<vmem>>, vector<8x512xf32>
    %c0_31 = arith.constant 0 : index
    %c0_32 = arith.constant 0 : index
    %90 = vector.load %arg2[%c0_31, %c0_32] : memref<128x512xf32, #tpu.memory_space<vmem>>, vector<128x512xf32>
    %cst_33 = arith.constant dense<0.000000e+00> : vector<8x512xf32>
    %91 = tpu.matmul %88, %90, %cst_33 {dimension_numbers = #tpu.dot_dimension_numbers<[1], [0], [0], [1], [0, 0, 1, 1], [], []>} : vector<8x128xf32>, vector<128x512xf32>, vector<8x512xf32> -> vector<8x512xf32>
    %92 = arith.addf %89, %91 : vector<8x512xf32>
    %93 = vector.extract_strided_slice %92 {offsets = [0, 0], sizes = [8, 384], strides = [1, 1]} : vector<8x512xf32> to vector<8x384xf32>
    %94 = arith.negf %93 : vector<8x384xf32>
    %95 = math.exp %94 : vector<8x384xf32>
    %cst_34 = arith.constant 1.000000e+00 : f32
    %96 = vector.broadcast %cst_34 : f32 to vector<8x384xf32>
    %97 = arith.addf %96, %95 : vector<8x384xf32>
    %98 = arith.divf %96, %97 : vector<8x384xf32>
    %99 = vector.extract_strided_slice %92 {offsets = [0, 384], sizes = [8, 128], strides = [1, 1]} : vector<8x512xf32> to vector<8x128xf32>
    %100 = math.tanh %99 : vector<8x128xf32>
    %101 = vector.extract_strided_slice %98 {offsets = [0, 0], sizes = [8, 128], strides = [1, 1]} : vector<8x384xf32> to vector<8x128xf32>
    %102 = vector.extract_strided_slice %98 {offsets = [0, 128], sizes = [8, 128], strides = [1, 1]} : vector<8x384xf32> to vector<8x128xf32>
    %103 = vector.extract_strided_slice %98 {offsets = [0, 256], sizes = [8, 128], strides = [1, 1]} : vector<8x384xf32> to vector<8x128xf32>
    %104 = arith.mulf %102, %86 : vector<8x128xf32>
    %105 = arith.mulf %101, %100 : vector<8x128xf32>
    %106 = arith.addf %104, %105 : vector<8x128xf32>
    %107 = math.tanh %106 : vector<8x128xf32>
    %108 = arith.mulf %103, %107 : vector<8x128xf32>
    %c40 = arith.constant 40 : index
    %c0_35 = arith.constant 0 : index
    %109 = vector.load %arg7[%c40, %c0_35] : memref<64x512xf32, #tpu.memory_space<vmem>>, vector<8x512xf32>
    %c0_36 = arith.constant 0 : index
    %c0_37 = arith.constant 0 : index
    %110 = vector.load %arg2[%c0_36, %c0_37] : memref<128x512xf32, #tpu.memory_space<vmem>>, vector<128x512xf32>
    %cst_38 = arith.constant dense<0.000000e+00> : vector<8x512xf32>
    %111 = tpu.matmul %108, %110, %cst_38 {dimension_numbers = #tpu.dot_dimension_numbers<[1], [0], [0], [1], [0, 0, 1, 1], [], []>} : vector<8x128xf32>, vector<128x512xf32>, vector<8x512xf32> -> vector<8x512xf32>
    %112 = arith.addf %109, %111 : vector<8x512xf32>
    %113 = vector.extract_strided_slice %112 {offsets = [0, 0], sizes = [8, 384], strides = [1, 1]} : vector<8x512xf32> to vector<8x384xf32>
    %114 = arith.negf %113 : vector<8x384xf32>
    %115 = math.exp %114 : vector<8x384xf32>
    %cst_39 = arith.constant 1.000000e+00 : f32
    %116 = vector.broadcast %cst_39 : f32 to vector<8x384xf32>
    %117 = arith.addf %116, %115 : vector<8x384xf32>
    %118 = arith.divf %116, %117 : vector<8x384xf32>
    %119 = vector.extract_strided_slice %112 {offsets = [0, 384], sizes = [8, 128], strides = [1, 1]} : vector<8x512xf32> to vector<8x128xf32>
    %120 = math.tanh %119 : vector<8x128xf32>
    %121 = vector.extract_strided_slice %118 {offsets = [0, 0], sizes = [8, 128], strides = [1, 1]} : vector<8x384xf32> to vector<8x128xf32>
    %122 = vector.extract_strided_slice %118 {offsets = [0, 128], sizes = [8, 128], strides = [1, 1]} : vector<8x384xf32> to vector<8x128xf32>
    %123 = vector.extract_strided_slice %118 {offsets = [0, 256], sizes = [8, 128], strides = [1, 1]} : vector<8x384xf32> to vector<8x128xf32>
    %124 = arith.mulf %122, %106 : vector<8x128xf32>
    %125 = arith.mulf %121, %120 : vector<8x128xf32>
    %126 = arith.addf %124, %125 : vector<8x128xf32>
    %127 = math.tanh %126 : vector<8x128xf32>
    %128 = arith.mulf %123, %127 : vector<8x128xf32>
    %c48 = arith.constant 48 : index
    %c0_40 = arith.constant 0 : index
    %129 = vector.load %arg7[%c48, %c0_40] : memref<64x512xf32, #tpu.memory_space<vmem>>, vector<8x512xf32>
    %c0_41 = arith.constant 0 : index
    %c0_42 = arith.constant 0 : index
    %130 = vector.load %arg2[%c0_41, %c0_42] : memref<128x512xf32, #tpu.memory_space<vmem>>, vector<128x512xf32>
    %cst_43 = arith.constant dense<0.000000e+00> : vector<8x512xf32>
    %131 = tpu.matmul %128, %130, %cst_43 {dimension_numbers = #tpu.dot_dimension_numbers<[1], [0], [0], [1], [0, 0, 1, 1], [], []>} : vector<8x128xf32>, vector<128x512xf32>, vector<8x512xf32> -> vector<8x512xf32>
    %132 = arith.addf %129, %131 : vector<8x512xf32>
    %133 = vector.extract_strided_slice %132 {offsets = [0, 0], sizes = [8, 384], strides = [1, 1]} : vector<8x512xf32> to vector<8x384xf32>
    %134 = arith.negf %133 : vector<8x384xf32>
    %135 = math.exp %134 : vector<8x384xf32>
    %cst_44 = arith.constant 1.000000e+00 : f32
    %136 = vector.broadcast %cst_44 : f32 to vector<8x384xf32>
    %137 = arith.addf %136, %135 : vector<8x384xf32>
    %138 = arith.divf %136, %137 : vector<8x384xf32>
    %139 = vector.extract_strided_slice %132 {offsets = [0, 384], sizes = [8, 128], strides = [1, 1]} : vector<8x512xf32> to vector<8x128xf32>
    %140 = math.tanh %139 : vector<8x128xf32>
    %141 = vector.extract_strided_slice %138 {offsets = [0, 0], sizes = [8, 128], strides = [1, 1]} : vector<8x384xf32> to vector<8x128xf32>
    %142 = vector.extract_strided_slice %138 {offsets = [0, 128], sizes = [8, 128], strides = [1, 1]} : vector<8x384xf32> to vector<8x128xf32>
    %143 = vector.extract_strided_slice %138 {offsets = [0, 256], sizes = [8, 128], strides = [1, 1]} : vector<8x384xf32> to vector<8x128xf32>
    %144 = arith.mulf %142, %126 : vector<8x128xf32>
    %145 = arith.mulf %141, %140 : vector<8x128xf32>
    %146 = arith.addf %144, %145 : vector<8x128xf32>
    %147 = math.tanh %146 : vector<8x128xf32>
    %148 = arith.mulf %143, %147 : vector<8x128xf32>
    %c56 = arith.constant 56 : index
    %c0_45 = arith.constant 0 : index
    %149 = vector.load %arg7[%c56, %c0_45] : memref<64x512xf32, #tpu.memory_space<vmem>>, vector<8x512xf32>
    %c0_46 = arith.constant 0 : index
    %c0_47 = arith.constant 0 : index
    %150 = vector.load %arg2[%c0_46, %c0_47] : memref<128x512xf32, #tpu.memory_space<vmem>>, vector<128x512xf32>
    %cst_48 = arith.constant dense<0.000000e+00> : vector<8x512xf32>
    %151 = tpu.matmul %148, %150, %cst_48 {dimension_numbers = #tpu.dot_dimension_numbers<[1], [0], [0], [1], [0, 0, 1, 1], [], []>} : vector<8x128xf32>, vector<128x512xf32>, vector<8x512xf32> -> vector<8x512xf32>
    %152 = arith.addf %149, %151 : vector<8x512xf32>
    %153 = vector.extract_strided_slice %152 {offsets = [0, 0], sizes = [8, 384], strides = [1, 1]} : vector<8x512xf32> to vector<8x384xf32>
    %154 = arith.negf %153 : vector<8x384xf32>
    %155 = math.exp %154 : vector<8x384xf32>
    %cst_49 = arith.constant 1.000000e+00 : f32
    %156 = vector.broadcast %cst_49 : f32 to vector<8x384xf32>
    %157 = arith.addf %156, %155 : vector<8x384xf32>
    %158 = arith.divf %156, %157 : vector<8x384xf32>
    %159 = vector.extract_strided_slice %152 {offsets = [0, 384], sizes = [8, 128], strides = [1, 1]} : vector<8x512xf32> to vector<8x128xf32>
    %160 = math.tanh %159 : vector<8x128xf32>
    %161 = vector.extract_strided_slice %158 {offsets = [0, 0], sizes = [8, 128], strides = [1, 1]} : vector<8x384xf32> to vector<8x128xf32>
    %162 = vector.extract_strided_slice %158 {offsets = [0, 128], sizes = [8, 128], strides = [1, 1]} : vector<8x384xf32> to vector<8x128xf32>
    %163 = vector.extract_strided_slice %158 {offsets = [0, 256], sizes = [8, 128], strides = [1, 1]} : vector<8x384xf32> to vector<8x128xf32>
    %164 = arith.mulf %162, %146 : vector<8x128xf32>
    %165 = arith.mulf %161, %160 : vector<8x128xf32>
    %166 = arith.addf %164, %165 : vector<8x128xf32>
    %167 = math.tanh %166 : vector<8x128xf32>
    %168 = arith.mulf %163, %167 : vector<8x128xf32>
    %c0_50 = arith.constant 0 : index
    %c0_51 = arith.constant 0 : index
    %169 = vector.load %arg4[%c0_50, %c0_51] : memref<128x128xf32, #tpu.memory_space<vmem>>, vector<128x128xf32>
    %cst_52 = arith.constant dense<0.000000e+00> : vector<8x128xf32>
    %170 = tpu.matmul %168, %169, %cst_52 {dimension_numbers = #tpu.dot_dimension_numbers<[1], [0], [0], [1], [0, 0, 1, 1], [], []>} : vector<8x128xf32>, vector<128x128xf32>, vector<8x128xf32> -> vector<8x128xf32>
    %c0_53 = arith.constant 0 : index
    %c0_54 = arith.constant 0 : index
    %171 = vector.load %arg5[%c0_53, %c0_54] : memref<1x128xf32, #tpu.memory_space<vmem>>, vector<1x128xf32>
    %172 = vector.broadcast %171 : vector<1x128xf32> to vector<8x128xf32>
    %173 = arith.addf %170, %172 : vector<8x128xf32>
    %174 = arith.negf %173 : vector<8x128xf32>
    %175 = math.exp %174 : vector<8x128xf32>
    %cst_55 = arith.constant 1.000000e+00 : f32
    %176 = vector.broadcast %cst_55 : f32 to vector<8x128xf32>
    %177 = arith.addf %176, %175 : vector<8x128xf32>
    %178 = arith.divf %176, %177 : vector<8x128xf32>
    %c0_56 = arith.constant 0 : index
    %c0_57 = arith.constant 0 : index
    %179 = vector.load %arg6[%c0_56, %c0_57] : memref<8x128xf32, #tpu.memory_space<vmem>>, vector<8x128xf32>
    tpu.vector_store %arg6[%c0_56, %c0_57], %178 {strides = array<i32>} : memref<8x128xf32, #tpu.memory_space<vmem>>, vector<8x128xf32>,
    return
  }
}

</mosaic_0001>

<bundles_post_ra>
// kernel: lotto_model_forward.1
= control target key start
LH: loop header
LB: loop body
LE: loop exit
PB: predicated region body
PF: predicated region fallthrough
CT: control target
= control target key end

     0   :  { %11 = vsyncpa [#allocation4], 0  ;;  %s3374_s0 = inlined_call_operand.vmem [shape: f32[64,128], index: 0, kind: input, shape index: {}]   ;;  %s3375_s1 = inlined_call_operand.hbm [shape: f32[128,512], index: 1, kind: input, shape index: {}]   ;;  %s3376_s2 = inlined_call_operand.hbm [shape: f32[128,512], index: 2, kind: input, shape index: {}]   ;;  %s3377_s3 = inlined_call_operand.vmem [shape: f32[1,512], index: 3, kind: input, shape index: {}]   ;;  %s3378_s4 = inlined_call_operand.hbm [shape: f32[128,128], index: 4, kind: input, shape index: {}]   ;;  %s3379_s5 = inlined_call_operand.vmem [shape: f32[1,128], index: 5, kind: input, shape index: {}]   ;;  %s3380_s6 = inlined_call_operand.vmem [shape: f32[8,128], index: 6, kind: output, shape index: {}]  }
   0x1   :  { %12 = vsyncpa [#allocation6], 0  ;;  %s2325_s21 = smov [#allocation5]   ;;  %s2326_s23 = smov [#allocation3]  }
   0x2   :  { %s32_s22 = sshll.u32 %s2325_s21, 4  ;;  %s20_s24 = sshll.u32 %s2326_s23, 4  ;;  %s33_s22 = int_to_ptr.vmem [resolvable:$true] %s32_s22  ;;  %s21_s24 = int_to_ptr.vmem [resolvable:$true] %s20_s24 }
   0x3   :  { %s2269_s25 = scalar_lea.vmem %s33_s22, 8192  ;;  %p2274_p1 = scmp.lt.s32.totalorder %s33_s22, %s33_s22 }
   0x4   :  { %p2270_p0 = scmp.ne.s32.totalorder %s33_s22, %s2269_s25  ;;  %p2275_p2 = scmp.lt.s32.totalorder %s2269_s25, %s2269_s25 }
   0x6   :  { %p2276_p3 = por %p2275_p2, %p2274_p1 }
   0x8   :  { %p2277_p4 = pnand %p2276_p3, %p2270_p0 }
   0xa   :  { %2280 = shalt.err (!%p2277_p4)
}
   0xb   :  { %s2327_s26 = smov 512   ;;  %s2328_s27 = smov 32  }
   0xc   :  { %38 = dma.hbm_to_vmem [thread:$0]  %s3376_s2, 8192, %s33_s22, [#allocation6], %s2327_s26, %s2327_s26, %s2328_s27  }
   0xd   :  { %s2289_s30 = scalar_lea.vmem %s21_s24, 8192  ;;  %p2294_p6 = scmp.lt.s32.totalorder %s21_s24, %s21_s24 }
   0xe   :  { %p2290_p5 = scmp.ne.s32.totalorder %s21_s24, %s2289_s30  ;;  %p2295_p7 = scmp.lt.s32.totalorder %s2289_s30, %s2289_s30 }
  0x10   :  { %p2296_p8 = por %p2295_p7, %p2294_p6 }
  0x12   :  { %p2297_p9 = pnand %p2296_p8, %p2290_p5 }
  0x14   :  { %2300 = shalt.err (!%p2297_p9)
}
  0x15   :  { %26 = dma.hbm_to_vmem [thread:$0]  %s3375_s1, 8192, %s21_s24, [#allocation4], %s2327_s26, %s2327_s26, %s2328_s27  }
  0x16   :  { %s2329_s9 = smov [#allocation7]  }
  0x17   :  { %s46_s10 = sshll.u32 %s2329_s9, 4  ;;  %s47_s10 = int_to_ptr.vmem [resolvable:$true] %s46_s10 }
  0x18   :  { %s2309_s11 = scalar_lea.vmem %s47_s10, 2048  ;;  %p2314_p11 = scmp.lt.s32.totalorder %s47_s10, %s47_s10 }
  0x19   :  { %p2310_p10 = scmp.ne.s32.totalorder %s47_s10, %s2309_s11  ;;  %p2315_p12 = scmp.lt.s32.totalorder %s2309_s11, %s2309_s11 }
  0x1b   :  { %p2316_p13 = por %p2315_p12, %p2314_p11 }
  0x1d   :  { %p2317_p0 = pnand %p2316_p13, %p2310_p10 }
  0x1f   :  { %2320 = shalt.err (!%p2317_p0)
}
  0x20   :  { %s2330_s2 = smov 128   ;;  %s2331_s12 = smov 8  }
  0x21   :  { %52 = dma.hbm_to_vmem [thread:$0]  %s3378_s4, 2048, %s47_s10, [#allocation6], %s2330_s2, %s2330_s2, %s2331_s12  }
  0x22   :  { %2321 = dma.done.wait [#allocation4], 8192  }
  0x23   :  { %2322 = vsyncadd [#allocation4], 4294959104 }
  0x24   :  { %2323 = dma.done.wait [#allocation6], 10240  }
  0x25   :  { %2324 = vsyncadd [#allocation6], 4294957056  ;;  %v3381_v0 = vmov 0.0   ;;  %v133_v1 = vld [vmem:[#allocation3 + $0x1e8] sm:$0xff]  ;;  %v135_v2 = vld [vmem:[#allocation3 + $0x1f8] sm:$0xff]  ;;  %vm2333_vm0 = vmmov 0  }
  0x26   :  { %222 = vmatprep.mubr.f32.mxu0 %v3381_v0  ;;  %335 = vmatprep.mubr.f32.mxu1 %v3381_v0  ;;  %v132_v3 = vld [vmem:[#allocation3 + $0x1e0] sm:$0xff]  ;;  %v134_v4 = vld [vmem:[#allocation3 + $0x1f0] sm:$0xff]  ;;  %v129_v5 = vld [vmem:[#allocation3 + $0x1c8] sm:$0xff] }
  0x27   :  { %158 = vmatprep.subr.mxu0 %v133_v1  ;;  %271 = vmatprep.subr.mxu1 %v135_v2  ;;  %v131_v6 = vld [vmem:[#allocation3 + $0x1d8] sm:$0xff]  ;;  %v128_v7 = vld [vmem:[#allocation3 + $0x1c0] sm:$0xff]  ;;  %v130_v8 = vld [vmem:[#allocation3 + $0x1d0] sm:$0xff] }
  0x28   :  { %159 = vmatpush1.msra.mxu0 %v132_v3  ;;  %272 = vmatpush1.msra.mxu1 %v134_v4  ;;  %v125_v9 = vld [vmem:[#allocation3 + $0x1a8] sm:$0xff]  ;;  %v127_v10 = vld [vmem:[#allocation3 + $0x1b8] sm:$0xff]  ;;  %v124_v11 = vld [vmem:[#allocation3 + $0x1a0] sm:$0xff] }
  0x29   :  { %160 = vmatprep.subr.mxu0 %v129_v5  ;;  %273 = vmatprep.subr.mxu1 %v131_v6  ;;  %v126_v12 = vld [vmem:[#allocation3 + $0x1b0] sm:$0xff]  ;;  %v121_v13 = vld [vmem:[#allocation3 + $0x188] sm:$0xff]  ;;  %v123_v14 = vld [vmem:[#allocation3 + $0x198] sm:$0xff] }
  0x2a   :  { %161 = vmatpush1.msra.mxu0 %v128_v7  ;;  %274 = vmatpush1.msra.mxu1 %v130_v8  ;;  %v120_v15 = vld [vmem:[#allocation3 + $0x180] sm:$0xff]  ;;  %v122_v16 = vld [vmem:[#allocation3 + $0x190] sm:$0xff]  ;;  %v117_v17 = vld [vmem:[#allocation3 + $0x168] sm:$0xff] }
  0x2b   :  { %162 = vmatprep.subr.mxu0 %v125_v9  ;;  %275 = vmatprep.subr.mxu1 %v127_v10  ;;  %v119_v18 = vld [vmem:[#allocation3 + $0x178] sm:$0xff]  ;;  %v116_v19 = vld [vmem:[#allocation3 + $0x160] sm:$0xff]  ;;  %v118_v20 = vld [vmem:[#allocation3 + $0x170] sm:$0xff] }
  0x2c   :  { %163 = vmatpush1.msra.mxu0 %v124_v11  ;;  %276 = vmatpush1.msra.mxu1 %v126_v12  ;;  %v113_v21 = vld [vmem:[#allocation3 + $0x148] sm:$0xff]  ;;  %v115_v22 = vld [vmem:[#allocation3 + $0x158] sm:$0xff]  ;;  %v112_v23 = vld [vmem:[#allocation3 + $0x140] sm:$0xff] }
  0x2d   :  { %164 = vmatprep.subr.mxu0 %v121_v13  ;;  %277 = vmatprep.subr.mxu1 %v123_v14  ;;  %v114_v24 = vld [vmem:[#allocation3 + $0x150] sm:$0xff]  ;;  %v109_v25 = vld [vmem:[#allocation3 + $0x128] sm:$0xff]  ;;  %v111_v26 = vld [vmem:[#allocation3 + $0x138] sm:$0xff] }
  0x2e   :  { %165 = vmatpush1.msra.mxu0 %v120_v15  ;;  %278 = vmatpush1.msra.mxu1 %v122_v16  ;;  %v108_v27 = vld [vmem:[#allocation3 + $0x120] sm:$0xff]  ;;  %v110_v28 = vld [vmem:[#allocation3 + $0x130] sm:$0xff]  ;;  %v105_v29 = vld [vmem:[#allocation3 + $0x108] sm:$0xff] }
  0x2f   :  { %166 = vmatprep.subr.mxu0 %v117_v17  ;;  %279 = vmatprep.subr.mxu1 %v119_v18  ;;  %v107_v30 = vld [vmem:[#allocation3 + $0x118] sm:$0xff]  ;;  %v104_v31 = vld [vmem:[#allocation3 + $0x100] sm:$0xff]  ;;  %v106_v32 = vld [vmem:[#allocation3 + $0x110] sm:$0xff] }
  0x30   :  { %167 = vmatpush1.msra.mxu0 %v116_v19  ;;  %280 = vmatpush1.msra.mxu1 %v118_v20  ;;  %v101_v33 = vld [vmem:[#allocation3 + $0xe8] sm:$0xff]  ;;  %v103_v34 = vld [vmem:[#allocation3 + $0xf8] sm:$0xff]  ;;  %v100_v35 = vld [vmem:[#allocation3 + $0xe0] sm:$0xff] }
  0x31   :  { %168 = vmatprep.subr.mxu0 %v113_v21  ;;  %281 = vmatprep.subr.mxu1 %v115_v22  ;;  %v102_v36 = vld [vmem:[#allocation3 + $0xf0] sm:$0xff]  ;;  %v97_v37 = vld [vmem:[#allocation3 + $0xc8] sm:$0xff]  ;;  %v99_v38 = vld [vmem:[#allocation3 + $0xd8] sm:$0xff] }
  0x32   :  { %169 = vmatpush1.msra.mxu0 %v112_v23  ;;  %282 = vmatpush1.msra.mxu1 %v114_v24  ;;  %v96_v39 = vld [vmem:[#allocation3 + $0xc0] sm:$0xff]  ;;  %v98_v40 = vld [vmem:[#allocation3 + $0xd0] sm:$0xff]  ;;  %v93_v41 = vld [vmem:[#allocation3 + $0xa8] sm:$0xff] }
  0x33   :  { %170 = vmatprep.subr.mxu0 %v109_v25  ;;  %283 = vmatprep.subr.mxu1 %v111_v26  ;;  %v95_v42 = vld [vmem:[#allocation3 + $0xb8] sm:$0xff]  ;;  %v92_v43 = vld [vmem:[#allocation3 + $0xa0] sm:$0xff]  ;;  %v94_v44 = vld [vmem:[#allocation3 + $0xb0] sm:$0xff] }
  0x34   :  { %171 = vmatpush1.msra.mxu0 %v108_v27  ;;  %284 = vmatpush1.msra.mxu1 %v110_v28  ;;  %v89_v45 = vld [vmem:[#allocation3 + $0x88] sm:$0xff]  ;;  %v91_v46 = vld [vmem:[#allocation3 + $0x98] sm:$0xff]  ;;  %v88_v47 = vld [vmem:[#allocation3 + $0x80] sm:$0xff] }
  0x35   :  { %172 = vmatprep.subr.mxu0 %v105_v29  ;;  %285 = vmatprep.subr.mxu1 %v107_v30  ;;  %v90_v48 = vld [vmem:[#allocation3 + $0x90] sm:$0xff]  ;;  %v85_v49 = vld [vmem:[#allocation3 + $0x68] sm:$0xff]  ;;  %v87_v50 = vld [vmem:[#allocation3 + $0x78] sm:$0xff] }
  0x36   :  { %173 = vmatpush1.msra.mxu0 %v104_v31  ;;  %286 = vmatpush1.msra.mxu1 %v106_v32  ;;  %v84_v51 = vld [vmem:[#allocation3 + $0x60] sm:$0xff]  ;;  %v86_v52 = vld [vmem:[#allocation3 + $0x70] sm:$0xff]  ;;  %v81_v53 = vld [vmem:[#allocation3 + $0x48] sm:$0xff] }
  0x37   :  { %174 = vmatprep.subr.mxu0 %v101_v33  ;;  %287 = vmatprep.subr.mxu1 %v103_v34  ;;  %v83_v54 = vld [vmem:[#allocation3 + $0x58] sm:$0xff]  ;;  %v80_v55 = vld [vmem:[#allocation3 + $0x40] sm:$0xff]  ;;  %v82_v56 = vld [vmem:[#allocation3 + $0x50] sm:$0xff] }
  0x38   :  { %175 = vmatpush1.msra.mxu0 %v100_v35  ;;  %288 = vmatpush1.msra.mxu1 %v102_v36  ;;  %v77_v57 = vld [vmem:[#allocation3 + $0x28] sm:$0xff]  ;;  %v79_v58 = vld [vmem:[#allocation3 + $0x38] sm:$0xff]  ;;  %v76_v59 = vld [vmem:[#allocation3 + $0x20] sm:$0xff] }
  0x39   :  { %176 = vmatprep.subr.mxu0 %v97_v37  ;;  %289 = vmatprep.subr.mxu1 %v99_v38  ;;  %v78_v60 = vld [vmem:[#allocation3 + $0x30] sm:$0xff]  ;;  %v73_v61 = vld [vmem:[#allocation3 + $0x8] sm:$0xff]  ;;  %v75_v62 = vld [vmem:[#allocation3 + $0x18] sm:$0xff] }
  0x3a   :  { %177 = vmatpush1.msra.mxu0 %v96_v39  ;;  %290 = vmatpush1.msra.mxu1 %v98_v40  ;;  %v72_v63 = vld [vmem:[#allocation3] sm:$0xff]  ;;  %v74_v1 = vld [vmem:[#allocation3 + $0x10] sm:$0xff]  ;;  %v2383_v3 = vld [vmem:[#allocation5 + $0x1e8] sm:$0xff] }
  0x3b   :  { %178 = vmatprep.subr.mxu0 %v93_v41  ;;  %291 = vmatprep.subr.mxu1 %v95_v42  ;;  %v64_v2 = vld [vmem:[%s3374_s0] sm:$0xff]  ;;  %3469 = vst [vmem:[#allocation10_spill] sm:$0xff] %v2383_v3  ;;  %v2385_v4 = vld [vmem:[#allocation5 + $0x1f8] sm:$0xff]  ;;  %v2389_v6 = vld [vmem:[#allocation5 + $0x1f0] sm:$0xff] }
  0x3c   :  { %179 = vmatpush1.msra.mxu0 %v92_v43  ;;  %292 = vmatpush1.msra.mxu1 %v94_v44  ;;  %3470 = vst [vmem:[#allocation11_spill] sm:$0xff] %v2385_v4  ;;  %v2387_v5 = vld [vmem:[#allocation5 + $0x1e0] sm:$0xff]  ;;  %v2391_v7 = vld [vmem:[#allocation5 + $0x1c8] sm:$0xff]  ;;  %v2393_v8 = vld [vmem:[#allocation5 + $0x1d8] sm:$0xff] }
  0x3d   :  { %180 = vmatprep.subr.mxu0 %v89_v45  ;;  %293 = vmatprep.subr.mxu1 %v91_v46  ;;  %v2399_v9 = vld [vmem:[#allocation5 + $0x1c0] sm:$0xff]  ;;  %v2401_v10 = vld [vmem:[#allocation5 + $0x1d0] sm:$0xff]  ;;  %v65_v11 = vld [vmem:[%s3374_s0 + $0x8] sm:$0xff] }
  0x3e   :  { %181 = vmatpush1.msra.mxu0 %v88_v47  ;;  %294 = vmatpush1.msra.mxu1 %v90_v48  ;;  %v2410_v12 = vld [vmem:[#allocation5 + $0x1a8] sm:$0xff]  ;;  %v2412_v13 = vld [vmem:[#allocation5 + $0x1b8] sm:$0xff]  ;;  %v2416_v14 = vld [vmem:[#allocation5 + $0x1a0] sm:$0xff] }
  0x3f   :  { %182 = vmatprep.subr.mxu0 %v85_v49  ;;  %295 = vmatprep.subr.mxu1 %v87_v50  ;;  %v2418_v15 = vld [vmem:[#allocation5 + $0x1b0] sm:$0xff]  ;;  %v2420_v16 = vld [vmem:[#allocation5 + $0x188] sm:$0xff]  ;;  %v2422_v17 = vld [vmem:[#allocation5 + $0x198] sm:$0xff] }
  0x40   :  { %183 = vmatpush1.msra.mxu0 %v84_v51  ;;  %296 = vmatpush1.msra.mxu1 %v86_v52  ;;  %v2428_v18 = vld [vmem:[#allocation5 + $0x180] sm:$0xff]  ;;  %v2430_v19 = vld [vmem:[#allocation5 + $0x190] sm:$0xff]  ;;  %v2439_v21 = vld [vmem:[#allocation5 + $0x168] sm:$0xff] }
  0x41   :  { %184 = vmatprep.subr.mxu0 %v81_v53  ;;  %297 = vmatprep.subr.mxu1 %v83_v54  ;;  %v66_v20 = vld [vmem:[%s3374_s0 + $0x10] sm:$0xff]  ;;  %v2441_v22 = vld [vmem:[#allocation5 + $0x178] sm:$0xff]  ;;  %v2445_v23 = vld [vmem:[#allocation5 + $0x160] sm:$0xff] }
  0x42   :  { %185 = vmatpush1.msra.mxu0 %v80_v55  ;;  %298 = vmatpush1.msra.mxu1 %v82_v56  ;;  %v2447_v24 = vld [vmem:[#allocation5 + $0x170] sm:$0xff]  ;;  %v2449_v25 = vld [vmem:[#allocation5 + $0x148] sm:$0xff]  ;;  %v2451_v26 = vld [vmem:[#allocation5 + $0x158] sm:$0xff] }
  0x43   :  { %186 = vmatprep.subr.mxu0 %v77_v57  ;;  %299 = vmatprep.subr.mxu1 %v79_v58  ;;  %v2457_v27 = vld [vmem:[#allocation5 + $0x140] sm:$0xff]  ;;  %v2459_v28 = vld [vmem:[#allocation5 + $0x150] sm:$0xff]  ;;  %v67_v29 = vld [vmem:[%s3374_s0 + $0x18] sm:$0xff] }
  0x44   :  { %187 = vmatpush1.msra.mxu0 %v76_v59  ;;  %300 = vmatpush1.msra.mxu1 %v78_v60  ;;  %v2468_v30 = vld [vmem:[#allocation5 + $0x128] sm:$0xff]  ;;  %v2470_v31 = vld [vmem:[#allocation5 + $0x138] sm:$0xff]  ;;  %v2474_v32 = vld [vmem:[#allocation5 + $0x120] sm:$0xff] }
  0x45   :  { %188 = vmatprep.subr.mxu0 %v73_v61  ;;  %301 = vmatprep.subr.mxu1 %v75_v62  ;;  %v2476_v33 = vld [vmem:[#allocation5 + $0x130] sm:$0xff]  ;;  %v2478_v34 = vld [vmem:[#allocation5 + $0x108] sm:$0xff]  ;;  %v2480_v35 = vld [vmem:[#allocation5 + $0x118] sm:$0xff] }
  0x46   :  { %189 = vmatpush1.msra.mxu0 %v72_v63  ;;  %302 = vmatpush1.msra.mxu1 %v74_v1  ;;  %v2486_v36 = vld [vmem:[#allocation5 + $0x100] sm:$0xff]  ;;  %v2488_v37 = vld [vmem:[#allocation5 + $0x110] sm:$0xff]  ;;  %v2497_v39 = vld [vmem:[#allocation5 + $0xe8] sm:$0xff] }
  0x47   :  { %223 = vmatmul.mubr.f32.vlgmr.msra.gmra.mxu0 %v64_v2  ;;  %336 = vmatmul.mubr.f32.vlgmr.msra.gmra.mxu1 %v64_v2  ;;  %v68_v38 = vld [vmem:[%s3374_s0 + $0x20] sm:$0xff]  ;;  %v2499_v40 = vld [vmem:[#allocation5 + $0xf8] sm:$0xff]  ;;  %v2505_v42 = vld [vmem:[#allocation5 + $0xf0] sm:$0xff] }
  0x48   :  { %484 = vmatprep.subr.mxu0 %v2383_v3  ;;  %555 = vmatprep.subr.mxu1 %v2385_v4  ;;  %v2503_v41 = vld [vmem:[#allocation5 + $0xe0] sm:$0xff]  ;;  %v2507_v43 = vld [vmem:[#allocation5 + $0xc8] sm:$0xff]  ;;  %v2509_v44 = vld [vmem:[#allocation5 + $0xd8] sm:$0xff] }
  0x49   :  { %485 = vmatpush1.msra.mxu0 %v2387_v5  ;;  %556 = vmatpush1.msra.mxu1 %v2389_v6  ;;  %v2515_v45 = vld [vmem:[#allocation5 + $0xc0] sm:$0xff]  ;;  %v2517_v46 = vld [vmem:[#allocation5 + $0xd0] sm:$0xff]  ;;  %v69_v47 = vld [vmem:[%s3374_s0 + $0x28] sm:$0xff] }
  0x4a   :  { %486 = vmatprep.subr.mxu0 %v2391_v7  ;;  %557 = vmatprep.subr.mxu1 %v2393_v8  ;;  %v2526_v48 = vld [vmem:[#allocation5 + $0xa8] sm:$0xff]  ;;  %v2528_v49 = vld [vmem:[#allocation5 + $0xb8] sm:$0xff]  ;;  %v2532_v50 = vld [vmem:[#allocation5 + $0xa0] sm:$0xff] }
  0x4b   :  { %228 = vmatprep.mubr.f32.mxu0 %v3381_v0  ;;  %341 = vmatprep.mubr.f32.mxu1 %v3381_v0  ;;  %v2534_v51 = vld [vmem:[#allocation5 + $0xb0] sm:$0xff]  ;;  %v2536_v52 = vld [vmem:[#allocation5 + $0x88] sm:$0xff]  ;;  %v2538_v53 = vld [vmem:[#allocation5 + $0x98] sm:$0xff] }
  0x4c   :  { %487 = vmatpush1.msra.mxu0 %v2399_v9  ;;  %558 = vmatpush1.msra.mxu1 %v2401_v10  ;;  %3471 = vst [vmem:[#allocation12_spill] sm:$0xff] %v2536_v52  ;;  %3472 = vst [vmem:[#allocation13_spill] sm:$0xff] %v2538_v53  ;;  %v2544_v54 = vld [vmem:[#allocation5 + $0x80] sm:$0xff]  ;;  %v2546_v55 = vld [vmem:[#allocation5 + $0x90] sm:$0xff] }
  0x4d   :  { %229 = vmatmul.mubr.f32.gmra.mxu0 %v65_v11  ;;  %342 = vmatmul.mubr.f32.gmra.mxu1 %v65_v11  ;;  %3473 = vst [vmem:[#allocation14_spill] sm:$0xff] %v2544_v54  ;;  %3474 = vst [vmem:[#allocation15_spill] sm:$0xff] %v2546_v55  ;;  %v70_v56 = vld [vmem:[%s3374_s0 + $0x30] sm:$0xff]  ;;  %v2555_v57 = vld [vmem:[#allocation5 + $0x68] sm:$0xff] }
  0x4e   :  { %488 = vmatprep.subr.mxu0 %v2410_v12  ;;  %559 = vmatprep.subr.mxu1 %v2412_v13  ;;  %3475 = vst [vmem:[#allocation16_spill] sm:$0xff] %v2555_v57  ;;  %v2557_v58 = vld [vmem:[#allocation5 + $0x78] sm:$0xff]  ;;  %v2561_v59 = vld [vmem:[#allocation5 + $0x60] sm:$0xff]  ;;  %v2563_v60 = vld [vmem:[#allocation5 + $0x70] sm:$0xff] }
  0x4f   :  { %489 = vmatpush1.msra.mxu0 %v2416_v14  ;;  %560 = vmatpush1.msra.mxu1 %v2418_v15  ;;  %3476 = vst [vmem:[#allocation17_spill] sm:$0xff] %v2557_v58  ;;  %3477 = vst [vmem:[#allocation18_spill] sm:$0xff] %v2561_v59  ;;  %v2565_v61 = vld [vmem:[#allocation5 + $0x48] sm:$0xff]  ;;  %v2567_v62 = vld [vmem:[#allocation5 + $0x58] sm:$0xff] }
  0x50   :  { %490 = vmatprep.subr.mxu0 %v2420_v16  ;;  %561 = vmatprep.subr.mxu1 %v2422_v17  ;;  %3478 = vst [vmem:[#allocation19_spill] sm:$0xff] %v2563_v60  ;;  %3479 = vst [vmem:[#allocation20_spill] sm:$0xff] %v2565_v61  ;;  %v2573_v63 = vld [vmem:[#allocation5 + $0x40] sm:$0xff]  ;;  %v2575_v1 = vld [vmem:[#allocation5 + $0x50] sm:$0xff] }
  0x51   :  { %234 = vmatprep.mubr.f32.mxu0 %v3381_v0  ;;  %347 = vmatprep.mubr.f32.mxu1 %v3381_v0  ;;  %3480 = vst [vmem:[#allocation21_spill] sm:$0xff] %v2567_v62  ;;  %3481 = vst [vmem:[#allocation22_spill] sm:$0xff] %v2573_v63  ;;  %v71_v2 = vld [vmem:[%s3374_s0 + $0x38] sm:$0xff]  ;;  %v2584_v11 = vld [vmem:[#allocation5 + $0x28] sm:$0xff] }
  0x52   :  { %491 = vmatpush1.msra.mxu0 %v2428_v18  ;;  %562 = vmatpush1.msra.mxu1 %v2430_v19  ;;  %3482 = vst [vmem:[#allocation23_spill] sm:$0xff] %v2575_v1  ;;  %3483 = vst [vmem:[#allocation24_spill] sm:$0xff] %v2584_v11 }
  0x53   :  { %235 = vmatmul.mubr.f32.gmra.mxu0 %v66_v20  ;;  %348 = vmatmul.mubr.f32.gmra.mxu1 %v66_v20  ;;  %v2586_v20 = vld [vmem:[#allocation5 + $0x38] sm:$0xff] }
  0x54   :  { %492 = vmatprep.subr.mxu0 %v2439_v21  ;;  %563 = vmatprep.subr.mxu1 %v2441_v22  ;;  %3484 = vst [vmem:[#allocation25_spill] sm:$0xff] %v2586_v20 }
  0x55   :  { %493 = vmatpush1.msra.mxu0 %v2445_v23  ;;  %564 = vmatpush1.msra.mxu1 %v2447_v24 }
  0x56   :  { %494 = vmatprep.subr.mxu0 %v2449_v25  ;;  %565 = vmatprep.subr.mxu1 %v2451_v26 }
  0x57   :  { %240 = vmatprep.mubr.f32.mxu0 %v3381_v0  ;;  %353 = vmatprep.mubr.f32.mxu1 %v3381_v0 }
  0x58   :  { %495 = vmatpush1.msra.mxu0 %v2457_v27  ;;  %566 = vmatpush1.msra.mxu1 %v2459_v28 }
  0x59   :  { %241 = vmatmul.mubr.f32.gmra.mxu0 %v67_v29  ;;  %354 = vmatmul.mubr.f32.gmra.mxu1 %v67_v29  ;;  %v2590_v29 = vld [vmem:[#allocation5 + $0x20] sm:$0xff] }
  0x5a   :  { %496 = vmatprep.subr.mxu0 %v2468_v30  ;;  %567 = vmatprep.subr.mxu1 %v2470_v31  ;;  %3485 = vst [vmem:[#allocation26_spill] sm:$0xff] %v2590_v29 }
  0x5b   :  { %497 = vmatpush1.msra.mxu0 %v2474_v32  ;;  %568 = vmatpush1.msra.mxu1 %v2476_v33 }
  0x5c   :  { %498 = vmatprep.subr.mxu0 %v2478_v34  ;;  %569 = vmatprep.subr.mxu1 %v2480_v35 }
  0x5d   :  { %246 = vmatprep.mubr.f32.mxu0 %v3381_v0  ;;  %359 = vmatprep.mubr.f32.mxu1 %v3381_v0 }
  0x5e   :  { %499 = vmatpush1.msra.mxu0 %v2486_v36  ;;  %570 = vmatpush1.msra.mxu1 %v2488_v37 }
  0x5f   :  { %247 = vmatmul.mubr.f32.gmra.mxu0 %v68_v38  ;;  %360 = vmatmul.mubr.f32.gmra.mxu1 %v68_v38  ;;  %v2592_v38 = vld [vmem:[#allocation5 + $0x30] sm:$0xff] }
  0x60   :  { %500 = vmatprep.subr.mxu0 %v2497_v39  ;;  %571 = vmatprep.subr.mxu1 %v2499_v40  ;;  %3486 = vst [vmem:[#allocation27_spill] sm:$0xff] %v2592_v38 }
  0x61   :  { %501 = vmatpush1.msra.mxu0 %v2503_v41  ;;  %572 = vmatpush1.msra.mxu1 %v2505_v42 }
  0x62   :  { %502 = vmatprep.subr.mxu0 %v2507_v43  ;;  %573 = vmatprep.subr.mxu1 %v2509_v44 }
  0x63   :  { %252 = vmatprep.mubr.f32.mxu0 %v3381_v0  ;;  %365 = vmatprep.mubr.f32.mxu1 %v3381_v0 }
  0x64   :  { %503 = vmatpush1.msra.mxu0 %v2515_v45  ;;  %574 = vmatpush1.msra.mxu1 %v2517_v46 }
  0x65   :  { %253 = vmatmul.mubr.f32.gmra.mxu0 %v69_v47  ;;  %366 = vmatmul.mubr.f32.gmra.mxu1 %v69_v47  ;;  %v2594_v47 = vld [vmem:[#allocation5 + $0x8] sm:$0xff] }
  0x66   :  { %504 = vmatprep.subr.mxu0 %v2526_v48  ;;  %575 = vmatprep.subr.mxu1 %v2528_v49  ;;  %3487 = vst [vmem:[#allocation28_spill] sm:$0xff] %v2594_v47 }
  0x67   :  { %505 = vmatpush1.msra.mxu0 %v2532_v50  ;;  %576 = vmatpush1.msra.mxu1 %v2534_v51 }
  0x68   :  { %506 = vmatprep.subr.mxu0 %v2536_v52  ;;  %577 = vmatprep.subr.mxu1 %v2538_v53 }
  0x69   :  { %258 = vmatprep.mubr.f32.mxu0 %v3381_v0  ;;  %371 = vmatprep.mubr.f32.mxu1 %v3381_v0 }
  0x6a   :  { %507 = vmatpush1.msra.mxu0 %v2544_v54  ;;  %578 = vmatpush1.msra.mxu1 %v2546_v55 }
  0x6b   :  { %259 = vmatmul.mubr.f32.gmra.mxu0 %v70_v56  ;;  %372 = vmatmul.mubr.f32.gmra.mxu1 %v70_v56  ;;  %v2596_v56 = vld [vmem:[#allocation5 + $0x18] sm:$0xff] }
  0x6c   :  { %508 = vmatprep.subr.mxu0 %v2555_v57  ;;  %579 = vmatprep.subr.mxu1 %v2557_v58  ;;  %3488 = vst [vmem:[#allocation29_spill] sm:$0xff] %v2596_v56 }
  0x6d   :  { %509 = vmatpush1.msra.mxu0 %v2561_v59  ;;  %580 = vmatpush1.msra.mxu1 %v2563_v60 }
  0x6e   :  { %510 = vmatprep.subr.mxu0 %v2565_v61  ;;  %581 = vmatprep.subr.mxu1 %v2567_v62 }
  0x6f   :  { %264 = vmatprep.mubr.f32.mxu0 %v3381_v0  ;;  %377 = vmatprep.mubr.f32.mxu1 %v3381_v0  ;;  %v2600_v0 = vld [vmem:[#allocation5] sm:$0xff] }
  0x70   :  { %511 = vmatpush1.msra.mxu0 %v2573_v63  ;;  %582 = vmatpush1.msra.mxu1 %v2575_v1  ;;  %3489 = vst [vmem:[#allocation30_spill] sm:$0xff] %v2600_v0  ;;  %v2604_v1 = vld [vmem:[#allocation5 + $0x10] sm:$0xff] }
  0x71   :  { %265 = vmatmul.mubr.f32.gmra.mxu0 %v71_v2  ;;  %378 = vmatmul.mubr.f32.gmra.mxu1 %v71_v2  ;;  %3490 = vst [vmem:[#allocation31_spill] sm:$0xff] %v2604_v1  ;;  %v3491_v2 = vmov 0.0  }
  0x72   :  { %512 = vmatprep.subr.mxu0 %v2584_v11  ;;  %583 = vmatprep.subr.mxu1 %v2586_v20 }
  0x73   :  { %513 = vmatpush1.msra.mxu0 %v2590_v29  ;;  %584 = vmatpush1.msra.mxu1 %v2592_v38 }
  0x74   :  { %514 = vmatprep.subr.mxu0 %v2594_v47  ;;  %585 = vmatprep.subr.mxu1 %v2596_v56 }
  0x75   :  { %515 = vmatpush1.msra.mxu0 %v2600_v0  ;;  %548 = vmatprep.mubr.f32.mxu0 %v3491_v2 }
  0x76   :  { %586 = vmatpush1.msra.mxu1 %v2604_v1  ;;  %619 = vmatprep.mubr.f32.mxu1 %v3491_v2 }
  0x77   :  { %549 = vmatmul.mubr.f32.vlgmr.msra.gmra.mxu0 %v3491_v2  ;;  %620 = vmatmul.mubr.f32.vlgmr.msra.gmra.mxu1 %v3491_v2 }
  0x78   :  { %658 = vmatprep.subr.mxu0 %v2383_v3  ;;  %729 = vmatprep.subr.mxu1 %v2385_v4 }
  0x79   :  { %659 = vmatpush1.msra.mxu0 %v2387_v5  ;;  %730 = vmatpush1.msra.mxu1 %v2389_v6 }
  0x7a   :  { %660 = vmatprep.subr.mxu0 %v2391_v7  ;;  %731 = vmatprep.subr.mxu1 %v2393_v8 }
  0x7b   :  { %661 = vmatpush1.msra.mxu0 %v2399_v9  ;;  %732 = vmatpush1.msra.mxu1 %v2401_v10 }
  0x7c   :  { %662 = vmatprep.subr.mxu0 %v2410_v12  ;;  %733 = vmatprep.subr.mxu1 %v2412_v13 }
  0x7d   :  { %663 = vmatpush1.msra.mxu0 %v2416_v14  ;;  %734 = vmatpush1.msra.mxu1 %v2418_v15 }
  0x7e   :  { %664 = vmatprep.subr.mxu0 %v2420_v16  ;;  %735 = vmatprep.subr.mxu1 %v2422_v17 }
  0x7f   :  { %665 = vmatpush1.msra.mxu0 %v2428_v18  ;;  %736 = vmatpush1.msra.mxu1 %v2430_v19 }
  0x80   :  { %666 = vmatprep.subr.mxu0 %v2439_v21  ;;  %737 = vmatprep.subr.mxu1 %v2441_v22 }
  0x81   :  { %667 = vmatpush1.msra.mxu0 %v2445_v23  ;;  %738 = vmatpush1.msra.mxu1 %v2447_v24 }
  0x82   :  { %668 = vmatprep.subr.mxu0 %v2449_v25  ;;  %739 = vmatprep.subr.mxu1 %v2451_v26 }
  0x83   :  { %669 = vmatpush1.msra.mxu0 %v2457_v27  ;;  %740 = vmatpush1.msra.mxu1 %v2459_v28 }
  0x84   :  { %670 = vmatprep.subr.mxu0 %v2468_v30  ;;  %741 = vmatprep.subr.mxu1 %v2470_v31 }
  0x85   :  { %671 = vmatpush1.msra.mxu0 %v2474_v32  ;;  %742 = vmatpush1.msra.mxu1 %v2476_v33 }
  0x86   :  { %672 = vmatprep.subr.mxu0 %v2478_v34  ;;  %743 = vmatprep.subr.mxu1 %v2480_v35 }
  0x87   :  { %673 = vmatpush1.msra.mxu0 %v2486_v36  ;;  %744 = vmatpush1.msra.mxu1 %v2488_v37 }
  0x88   :  { %674 = vmatprep.subr.mxu0 %v2497_v39  ;;  %745 = vmatprep.subr.mxu1 %v2499_v40 }
  0x89   :  { %675 = vmatpush1.msra.mxu0 %v2503_v41  ;;  %746 = vmatpush1.msra.mxu1 %v2505_v42 }
  0x8a   :  { %676 = vmatprep.subr.mxu0 %v2507_v43  ;;  %747 = vmatprep.subr.mxu1 %v2509_v44 }
  0x8b   :  { %677 = vmatpush1.msra.mxu0 %v2515_v45  ;;  %748 = vmatpush1.msra.mxu1 %v2517_v46 }
  0x8c   :  { %678 = vmatprep.subr.mxu0 %v2526_v48  ;;  %749 = vmatprep.subr.mxu1 %v2528_v49 }
  0x8d   :  { %679 = vmatpush1.msra.mxu0 %v2532_v50  ;;  %750 = vmatpush1.msra.mxu1 %v2534_v51 }
  0x8e   :  { %680 = vmatprep.subr.mxu0 %v2536_v52  ;;  %751 = vmatprep.subr.mxu1 %v2538_v53  ;;  %v3492_v52 = vld [vmem:[#allocation23_spill] sm:$0xff] }
  0x8f   :  { %681 = vmatpush1.msra.mxu0 %v2544_v54  ;;  %752 = vmatpush1.msra.mxu1 %v2546_v55 }
  0x90   :  { %682 = vmatprep.subr.mxu0 %v2555_v57  ;;  %753 = vmatprep.subr.mxu1 %v2557_v58 }
  0x91   :  { %683 = vmatpush1.msra.mxu0 %v2561_v59  ;;  %754 = vmatpush1.msra.mxu1 %v2563_v60 }
  0x92   :  { %684 = vmatprep.subr.mxu0 %v2565_v61  ;;  %755 = vmatprep.subr.mxu1 %v2567_v62 }
  0x93   :  { %685 = vmatpush1.msra.mxu0 %v2573_v63  ;;  %756 = vmatpush1.msra.mxu1 %v3492_v52 }
  0x94   :  { %686 = vmatprep.subr.mxu0 %v2584_v11  ;;  %757 = vmatprep.subr.mxu1 %v2586_v20  ;;  %v138_v20 = vlaneseq }
  0x95   :  { %687 = vmatpush1.msra.mxu0 %v2590_v29  ;;  %758 = vmatpush1.msra.mxu1 %v2592_v38 }
  0x96   :  { %688 = vmatprep.subr.mxu0 %v2594_v47  ;;  %759 = vmatprep.subr.mxu1 %v2596_v56  ;;  %v139_v29 = vshrl.u32 %v138_v20, 7 }
  0x97   :  { %689 = vmatpush1.msra.mxu0 %v2600_v0  ;;  %722 = vmatprep.mubr.f32.mxu0 %v3491_v2  ;;  %v136_v0 = vld [vmem:[%s3377_s3] sm:$0xf] }
  0x98   :  { %760 = vmatpush1.msra.mxu1 %v2604_v1  ;;  %793 = vmatprep.mubr.f32.mxu1 %v3491_v2  ;;  %v140_v47 = vsub.s32 0, %v139_v29  ;;  %v148_v56 = vsub.s32 2, %v139_v29  ;;  %v144_v2 = vsub.s32 1, %v139_v29 }
  0x99   :  { %832 = vmatprep.subr.mxu0 %v2383_v3  ;;  %903 = vmatprep.subr.mxu1 %v2385_v4  ;;  %v152_v3 = vsub.s32 3, %v139_v29 }
  0x9a   :  { %v141_v63 = vrot.slane %v136_v0, %v140_v47  ;;  %v2693_v4 = vrot.slane %v136_v0, %v148_v56  ;;  %v145_v61 = vrot.slane %v136_v0, %v144_v2 }
  0x9b   :  { %v2695_v60 = vrot.slane %v136_v0, %v152_v3 }
 0x107   :  { %v2682_v11 = vpop.f32.mrf.mxu0  ;;  %v2684_v38 = vpop.f32.mrf.mxu1 }
 0x109   :  { %v2689_v52 = vpop.f32.mrf.mxu0  ;;  %v2691_v1 = vpop.f32.mrf.mxu1 }
 0x10d   :  { %v230_v20 = vpop.f32.mrf.mxu0  ;;  %v343_v62 = vpop.f32.mrf.mxu1 }
 0x10e   :  { %v2697_v59 = vadd.f32 %v230_v20, %v141_v63  ;;  %v2700_v58 = vadd.f32 %v343_v62, %v2693_v4 }
 0x10f   :  { %v232_v57 = vpop.f32.mrf.mxu0  ;;  %v345_v55 = vpop.f32.mrf.mxu1 }
 0x110   :  { %3493 = vst [vmem:[#allocation32_spill] sm:$0xff] %v2697_v59  ;;  %3494 = vst [vmem:[#allocation33_spill] sm:$0xff] %v2700_v58  ;;  %v2702_v54 = vadd.f32 %v232_v57, %v145_v61  ;;  %v2705_v53 = vadd.f32 %v345_v55, %v2695_v60 }
 0x112   :  { %3495 = vst [vmem:[#allocation34_spill] sm:$0xff] %v2702_v54  ;;  %3496 = vst [vmem:[#allocation35_spill] sm:$0xff] %v2705_v53 }
 0x113   :  { %v236_v29 = vpop.f32.mrf.mxu0  ;;  %v349_v47 = vpop.f32.mrf.mxu1 }
 0x114   :  { %v2707_v56 = vadd.f32 %v236_v29, %v141_v63  ;;  %v2710_v2 = vadd.f32 %v349_v47, %v2693_v4 }
 0x115   :  { %v238_v0 = vpop.f32.mrf.mxu0  ;;  %v351_v3 = vpop.f32.mrf.mxu1 }
 0x116   :  { %3497 = vst [vmem:[#allocation36_spill] sm:$0xff] %v2707_v56  ;;  %3498 = vst [vmem:[#allocation37_spill] sm:$0xff] %v2710_v2  ;;  %v2712_v20 = vadd.f32 %v238_v0, %v145_v61  ;;  %v2715_v62 = vadd.f32 %v351_v3, %v2695_v60 }
 0x118   :  { %3499 = vst [vmem:[#allocation38_spill] sm:$0xff] %v2712_v20  ;;  %3500 = vst [vmem:[#allocation39_spill] sm:$0xff] %v2715_v62 }
 0x119   :  { %v242_v58 = vpop.f32.mrf.mxu0  ;;  %v355_v57 = vpop.f32.mrf.mxu1 }
 0x11a   :  { %v2717_v54 = vadd.f32 %v242_v58, %v141_v63  ;;  %v2720_v55 = vadd.f32 %v355_v57, %v2693_v4 }
 0x11b   :  { %v244_v53 = vpop.f32.mrf.mxu0  ;;  %v357_v29 = vpop.f32.mrf.mxu1 }
 0x11c   :  { %3501 = vst [vmem:[#allocation40_spill] sm:$0xff] %v2717_v54  ;;  %3502 = vst [vmem:[#allocation41_spill] sm:$0xff] %v2720_v55  ;;  %v2722_v56 = vadd.f32 %v244_v53, %v145_v61  ;;  %v2725_v47 = vadd.f32 %v357_v29, %v2695_v60 }
 0x11e   :  { %3503 = vst [vmem:[#allocation42_spill] sm:$0xff] %v2722_v56  ;;  %3504 = vst [vmem:[#allocation43_spill] sm:$0xff] %v2725_v47 }
 0x11f   :  { %v248_v2 = vpop.f32.mrf.mxu0  ;;  %v361_v0 = vpop.f32.mrf.mxu1 }
 0x120   :  { %v2727_v20 = vadd.f32 %v248_v2, %v141_v63  ;;  %v2730_v3 = vadd.f32 %v361_v0, %v2693_v4 }
 0x121   :  { %v250_v62 = vpop.f32.mrf.mxu0  ;;  %v363_v58 = vpop.f32.mrf.mxu1 }
 0x122   :  { %3505 = vst [vmem:[#allocation44_spill] sm:$0xff] %v2727_v20  ;;  %3506 = vst [vmem:[#allocation45_spill] sm:$0xff] %v2730_v3  ;;  %v2732_v54 = vadd.f32 %v250_v62, %v145_v61  ;;  %v2735_v57 = vadd.f32 %v363_v58, %v2695_v60 }
 0x124   :  { %3507 = vst [vmem:[#allocation46_spill] sm:$0xff] %v2732_v54  ;;  %3508 = vst [vmem:[#allocation47_spill] sm:$0xff] %v2735_v57 }
 0x125   :  { %v254_v55 = vpop.f32.mrf.mxu0  ;;  %v367_v53 = vpop.f32.mrf.mxu1 }
 0x126   :  { %v2737_v56 = vadd.f32 %v254_v55, %v141_v63  ;;  %v2740_v29 = vadd.f32 %v367_v53, %v2693_v4 }
 0x127   :  { %v256_v47 = vpop.f32.mrf.mxu0  ;;  %v369_v2 = vpop.f32.mrf.mxu1 }
 0x128   :  { %3509 = vst [vmem:[#allocation48_spill] sm:$0xff] %v2737_v56  ;;  %3510 = vst [vmem:[#allocation49_spill] sm:$0xff] %v2740_v29  ;;  %v2742_v20 = vadd.f32 %v256_v47, %v145_v61  ;;  %v2745_v0 = vadd.f32 %v369_v2, %v2695_v60 }
 0x12a   :  { %3511 = vst [vmem:[#allocation50_spill] sm:$0xff] %v2742_v20  ;;  %3512 = vst [vmem:[#allocation51_spill] sm:$0xff] %v2745_v0 }
 0x12b   :  { %v260_v3 = vpop.f32.mrf.mxu0  ;;  %v373_v62 = vpop.f32.mrf.mxu1 }
 0x12c   :  { %v2747_v54 = vadd.f32 %v260_v3, %v141_v63  ;;  %v2750_v58 = vadd.f32 %v373_v62, %v2693_v4 }
 0x12d   :  { %v262_v57 = vpop.f32.mrf.mxu0  ;;  %v375_v55 = vpop.f32.mrf.mxu1 }
 0x12e   :  { %3513 = vst [vmem:[#allocation52_spill] sm:$0xff] %v2747_v54  ;;  %3514 = vst [vmem:[#allocation53_spill] sm:$0xff] %v2750_v58  ;;  %v2752_v56 = vadd.f32 %v262_v57, %v145_v61  ;;  %v2755_v53 = vadd.f32 %v375_v55, %v2695_v60  ;;  %v225_v57 = vadd.f32 %v2682_v11, %v141_v63 }
 0x12f   :  { %v227_v55 = vadd.f32 %v2689_v52, %v145_v61 }
 0x130   :  { %3515 = vst [vmem:[#allocation54_spill] sm:$0xff] %v2752_v56  ;;  %3516 = vst [vmem:[#allocation55_spill] sm:$0xff] %v2755_v53 }
 0x131   :  { %v266_v29 = vpop.f32.mrf.mxu0  ;;  %v379_v47 = vpop.f32.mrf.mxu1 }
 0x132   :  { %v2757_v20 = vadd.f32 %v266_v29, %v141_v63  ;;  %v2760_v2 = vadd.f32 %v379_v47, %v2693_v4 }
 0x133   :  { %v268_v0 = vpop.f32.mrf.mxu0  ;;  %v381_v3 = vpop.f32.mrf.mxu1 }
 0x134   :  { %3517 = vst [vmem:[#allocation56_spill] sm:$0xff] %v2757_v20  ;;  %3518 = vst [vmem:[#allocation57_spill] sm:$0xff] %v2760_v2  ;;  %v2762_v54 = vadd.f32 %v268_v0, %v145_v61  ;;  %v2765_v62 = vadd.f32 %v381_v3, %v2695_v60  ;;  %v338_v0 = vadd.f32 %v2684_v38, %v2693_v4 }
 0x135   :  { %v340_v3 = vadd.f32 %v2691_v1, %v2695_v60 }
 0x136   :  { %3519 = vst [vmem:[#allocation58_spill] sm:$0xff] %v2762_v54  ;;  %3520 = vst [vmem:[#allocation59_spill] sm:$0xff] %v2765_v62 }
 0x137   :  { %v550_v58 = vpop.f32.mrf.mxu0  ;;  %v621_v47 = vpop.f32.mrf.mxu1 }
 0x138   :  { %v626_v53 = vadd.f32 %v550_v58, %v225_v57  ;;  %v628_v2 = vadd.f32 %v621_v47, %v338_v0  ;;  %v3524_v47 = vld [vmem:[#allocation15_spill] sm:$0xff]  ;;  %v3525_v0 = vld [vmem:[#allocation16_spill] sm:$0xff] }
 0x139   :  { %v552_v56 = vpop.f32.mrf.mxu0  ;;  %v623_v54 = vpop.f32.mrf.mxu1 }
 0x13a   :  { %v1978_v59 = vmul.f32 -1.442695, %v626_v53  ;;  %v627_v29 = vadd.f32 %v552_v56, %v227_v55  ;;  %v1980_v63 = vmul.f32 -1.442695, %v628_v2  ;;  %v629_v62 = vadd.f32 %v623_v54, %v340_v3  ;;  %v3521_v2 = vld [vmem:[#allocation12_spill] sm:$0xff]  ;;  %v3526_v3 = vld [vmem:[#allocation17_spill] sm:$0xff] }
 0x13c   :  { %2065 = vpow2.f32 %v1978_v59  ;;  %v1979_v20 = vmul.f32 -1.442695, %v627_v29  ;;  %v3523_v29 = vld [vmem:[#allocation14_spill] sm:$0xff] }
 0x13e   :  { %2067 = vpow2.f32 %v1979_v20 }
 0x13f   :  { %2069 = vpow2.f32 %v1980_v63  ;;  %v3527_v63 = vld [vmem:[#allocation18_spill] sm:$0xff] }
 0x149   :  { %v2066_v11 = vpop.eup %2065 }
 0x14a   :  { %v639_v52 = vadd.f32 1.0, %v2066_v11  ;;  %v3528_v11 = vld [vmem:[#allocation19_spill] sm:$0xff] }
 0x14b   :  { %v2068_v61 = vpop.eup %2067 }
 0x14c   :  { %2071 = vrcp.f32 %v639_v52  ;;  %v640_v56 = vadd.f32 1.0, %v2068_v61  ;;  %v2070_v59 = vpop.eup %2069  ;;  %v3529_v52 = vld [vmem:[#allocation20_spill] sm:$0xff]  ;;  %v3530_v61 = vld [vmem:[#allocation21_spill] sm:$0xff] }
 0x14d   :  { %2073 = vtanh.f32 %v629_v62  ;;  %v641_v4 = vadd.f32 1.0, %v2070_v59  ;;  %v3522_v62 = vld [vmem:[#allocation13_spill] sm:$0xff]  ;;  %v3532_v59 = vld [vmem:[#allocation23_spill] sm:$0xff] }
 0x14e   :  { %2075 = vrcp.f32 %v640_v56  ;;  %v3531_v56 = vld [vmem:[#allocation22_spill] sm:$0xff] }
 0x14f   :  { %2077 = vrcp.f32 %v641_v4  ;;  %v3536_v4 = vld [vmem:[#allocation27_spill] sm:$0xff] }
 0x159   :  { %v2072_v20 = vpop.eup %2071 }
 0x15a   :  { %v2074_v58 = vpop.eup %2073 }
 0x15b   :  { %v2076_v53 = vpop.eup %2075  ;;  %v650_v57 = vmul.f32 %v2074_v58, %v2072_v20  ;;  %v3533_v20 = vld [vmem:[#allocation24_spill] sm:$0xff]  ;;  %v3534_v58 = vld [vmem:[#allocation25_spill] sm:$0xff] }
 0x15c   :  { %v649_v38 = vmul.f32 0.0, %v2076_v53  ;;  %v2078_v54 = vpop.eup %2077  ;;  %v3535_v53 = vld [vmem:[#allocation26_spill] sm:$0xff] }
 0x15e   :  { %v2773_v55 = vadd.f32 %v650_v57, %v649_v38  ;;  %v3537_v38 = vld [vmem:[#allocation28_spill] sm:$0xff]  ;;  %v3538_v57 = vld [vmem:[#allocation29_spill] sm:$0xff] }
 0x160   :  { %2079 = vtanh.f32 %v2773_v55 }
 0x16d   :  { %v2080_v60 = vpop.eup %2079 }
 0x16e   :  { %v653_v1 = vmul.f32 %v2080_v60, %v2078_v54  ;;  %v3539_v54 = vld [vmem:[#allocation30_spill] sm:$0xff]  ;;  %v3540_v60 = vmov 0.0  }
 0x170   :  { %723 = vmatmul.mubr.f32.vlgmr.msra.gmra.mxu0 %v653_v1  ;;  %794 = vmatmul.mubr.f32.vlgmr.msra.gmra.mxu1 %v653_v1  ;;  %v3541_v1 = vld [vmem:[#allocation31_spill] sm:$0xff] }
 0x171   :  { %833 = vmatpush1.msra.mxu0 %v2387_v5  ;;  %904 = vmatpush1.msra.mxu1 %v2389_v6 }
 0x172   :  { %834 = vmatprep.subr.mxu0 %v2391_v7  ;;  %905 = vmatprep.subr.mxu1 %v2393_v8 }
 0x173   :  { %835 = vmatpush1.msra.mxu0 %v2399_v9  ;;  %906 = vmatpush1.msra.mxu1 %v2401_v10 }
 0x174   :  { %836 = vmatprep.subr.mxu0 %v2410_v12  ;;  %907 = vmatprep.subr.mxu1 %v2412_v13 }
 0x175   :  { %837 = vmatpush1.msra.mxu0 %v2416_v14  ;;  %908 = vmatpush1.msra.mxu1 %v2418_v15 }
 0x176   :  { %838 = vmatprep.subr.mxu0 %v2420_v16  ;;  %909 = vmatprep.subr.mxu1 %v2422_v17 }
 0x177   :  { %839 = vmatpush1.msra.mxu0 %v2428_v18  ;;  %910 = vmatpush1.msra.mxu1 %v2430_v19 }
 0x178   :  { %840 = vmatprep.subr.mxu0 %v2439_v21  ;;  %911 = vmatprep.subr.mxu1 %v2441_v22 }
 0x179   :  { %841 = vmatpush1.msra.mxu0 %v2445_v23  ;;  %912 = vmatpush1.msra.mxu1 %v2447_v24 }
 0x17a   :  { %842 = vmatprep.subr.mxu0 %v2449_v25  ;;  %913 = vmatprep.subr.mxu1 %v2451_v26 }
 0x17b   :  { %843 = vmatpush1.msra.mxu0 %v2457_v27  ;;  %914 = vmatpush1.msra.mxu1 %v2459_v28 }
 0x17c   :  { %844 = vmatprep.subr.mxu0 %v2468_v30  ;;  %915 = vmatprep.subr.mxu1 %v2470_v31 }
 0x17d   :  { %845 = vmatpush1.msra.mxu0 %v2474_v32  ;;  %916 = vmatpush1.msra.mxu1 %v2476_v33 }
 0x17e   :  { %846 = vmatprep.subr.mxu0 %v2478_v34  ;;  %917 = vmatprep.subr.mxu1 %v2480_v35 }
 0x17f   :  { %847 = vmatpush1.msra.mxu0 %v2486_v36  ;;  %918 = vmatpush1.msra.mxu1 %v2488_v37 }
 0x180   :  { %848 = vmatprep.subr.mxu0 %v2497_v39  ;;  %919 = vmatprep.subr.mxu1 %v2499_v40 }
 0x181   :  { %849 = vmatpush1.msra.mxu0 %v2503_v41  ;;  %920 = vmatpush1.msra.mxu1 %v2505_v42 }
 0x182   :  { %850 = vmatprep.subr.mxu0 %v2507_v43  ;;  %921 = vmatprep.subr.mxu1 %v2509_v44 }
 0x183   :  { %851 = vmatpush1.msra.mxu0 %v2515_v45  ;;  %922 = vmatpush1.msra.mxu1 %v2517_v46 }
 0x184   :  { %852 = vmatprep.subr.mxu0 %v2526_v48  ;;  %923 = vmatprep.subr.mxu1 %v2528_v49 }
 0x185   :  { %853 = vmatpush1.msra.mxu0 %v2532_v50  ;;  %924 = vmatpush1.msra.mxu1 %v2534_v51 }
 0x186   :  { %854 = vmatprep.subr.mxu0 %v3521_v2  ;;  %925 = vmatprep.subr.mxu1 %v3522_v62 }
 0x187   :  { %855 = vmatpush1.msra.mxu0 %v3523_v29  ;;  %926 = vmatpush1.msra.mxu1 %v3524_v47 }
 0x188   :  { %856 = vmatprep.subr.mxu0 %v3525_v0  ;;  %927 = vmatprep.subr.mxu1 %v3526_v3 }
 0x189   :  { %857 = vmatpush1.msra.mxu0 %v3527_v63  ;;  %928 = vmatpush1.msra.mxu1 %v3528_v11  ;;  %v3546_v11 = vld [vmem:[#allocation33_spill] sm:$0xff] }
 0x18a   :  { %858 = vmatprep.subr.mxu0 %v3529_v52  ;;  %929 = vmatprep.subr.mxu1 %v3530_v61 }
 0x18b   :  { %859 = vmatpush1.msra.mxu0 %v3531_v56  ;;  %930 = vmatpush1.msra.mxu1 %v3532_v59  ;;  %v3542_v59 = vld [vmem:[#allocation10_spill] sm:$0xff] }
 0x18c   :  { %860 = vmatprep.subr.mxu0 %v3533_v20  ;;  %931 = vmatprep.subr.mxu1 %v3534_v58  ;;  %v3543_v20 = vld [vmem:[#allocation11_spill] sm:$0xff] }
 0x18d   :  { %861 = vmatpush1.msra.mxu0 %v3535_v53  ;;  %932 = vmatpush1.msra.mxu1 %v3536_v4  ;;  %v3544_v53 = vld [vmem:[#allocation32_spill] sm:$0xff] }
 0x18e   :  { %862 = vmatprep.subr.mxu0 %v3537_v38  ;;  %933 = vmatprep.subr.mxu1 %v3538_v57  ;;  %v3545_v38 = vld [vmem:[#allocation34_spill] sm:$0xff] }
 0x18f   :  { %863 = vmatpush1.msra.mxu0 %v3539_v54  ;;  %896 = vmatprep.mubr.f32.mxu0 %v3540_v60 }
 0x190   :  { %934 = vmatpush1.msra.mxu1 %v3541_v1  ;;  %967 = vmatprep.mubr.f32.mxu1 %v3540_v60  ;;  %v3547_v60 = vld [vmem:[#allocation35_spill] sm:$0xff] }
 0x191   :  { %1006 = vmatprep.subr.mxu0 %v3542_v59  ;;  %1077 = vmatprep.subr.mxu1 %v3543_v20 }
 0x230   :  { %v724_v58 = vpop.f32.mrf.mxu0  ;;  %v795_v54 = vpop.f32.mrf.mxu1 }
 0x231   :  { %v800_v56 = vadd.f32 %v724_v58, %v3544_v53  ;;  %v802_v63 = vadd.f32 %v795_v54, %v3546_v11 }
 0x232   :  { %v726_v4 = vpop.f32.mrf.mxu0  ;;  %v797_v1 = vpop.f32.mrf.mxu1 }
 0x233   :  { %v1981_v61 = vmul.f32 -1.442695, %v800_v56  ;;  %v801_v52 = vadd.f32 %v726_v4, %v3545_v38  ;;  %v1983_v3 = vmul.f32 -1.442695, %v802_v63  ;;  %v803_v0 = vadd.f32 %v797_v1, %v3547_v60 }
 0x235   :  { %2081 = vpow2.f32 %v1981_v61  ;;  %v1982_v57 = vmul.f32 -1.442695, %v801_v52 }
 0x237   :  { %2083 = vpow2.f32 %v1982_v57 }
 0x238   :  { %2085 = vpow2.f32 %v1983_v3 }
 0x239   :  { %2087 = vtanh.f32 %v803_v0 }
 0x242   :  { %v2082_v59 = vpop.eup %2081 }
 0x243   :  { %v813_v47 = vadd.f32 1.0, %v2082_v59  ;;  %v3570_v59 = vld [vmem:[#allocation37_spill] sm:$0xff] }
 0x244   :  { %v2084_v20 = vpop.eup %2083 }
 0x245   :  { %2089 = vrcp.f32 %v813_v47  ;;  %v814_v58 = vadd.f32 1.0, %v2084_v20  ;;  %v2086_v56 = vpop.eup %2085  ;;  %v3569_v47 = vld [vmem:[#allocation38_spill] sm:$0xff] }
 0x246   :  { %v2088_v53 = vpop.eup %2087  ;;  %v815_v38 = vadd.f32 1.0, %v2086_v56 }
 0x247   :  { %2091 = vrcp.f32 %v814_v58 }
 0x248   :  { %2093 = vrcp.f32 %v815_v38 }
 0x252   :  { %v2090_v61 = vpop.eup %2089 }
 0x253   :  { %v824_v52 = vmul.f32 %v2090_v61, %v2088_v53  ;;  %v3571_v53 = vld [vmem:[#allocation39_spill] sm:$0xff] }
 0x254   :  { %v2092_v4 = vpop.eup %2091 }
 0x255   :  { %v823_v11 = vmul.f32 %v2092_v4, %v2773_v55  ;;  %v2094_v63 = vpop.eup %2093 }
 0x257   :  { %v2847_v57 = vadd.f32 %v824_v52, %v823_v11 }
 0x259   :  { %2095 = vtanh.f32 %v2847_v57 }
 0x266   :  { %v2096_v3 = vpop.eup %2095 }
 0x267   :  { %v827_v54 = vmul.f32 %v2096_v3, %v2094_v63 }
 0x269   :  { %897 = vmatmul.mubr.f32.vlgmr.msra.gmra.mxu0 %v827_v54  ;;  %968 = vmatmul.mubr.f32.vlgmr.msra.gmra.mxu1 %v827_v54 }
 0x26a   :  { %1007 = vmatpush1.msra.mxu0 %v2387_v5  ;;  %1078 = vmatpush1.msra.mxu1 %v2389_v6  ;;  %v3548_v5 = vld [vmem:[#allocation15_spill] sm:$0xff]  ;;  %v3549_v6 = vld [vmem:[#allocation16_spill] sm:$0xff] }
 0x26b   :  { %1008 = vmatprep.subr.mxu0 %v2391_v7  ;;  %1079 = vmatprep.subr.mxu1 %v2393_v8  ;;  %v3550_v7 = vld [vmem:[#allocation17_spill] sm:$0xff]  ;;  %v3551_v8 = vld [vmem:[#allocation18_spill] sm:$0xff] }
 0x26c   :  { %1009 = vmatpush1.msra.mxu0 %v2399_v9  ;;  %1080 = vmatpush1.msra.mxu1 %v2401_v10  ;;  %v3552_v9 = vld [vmem:[#allocation19_spill] sm:$0xff]  ;;  %v3553_v10 = vld [vmem:[#allocation20_spill] sm:$0xff] }
 0x26d   :  { %1010 = vmatprep.subr.mxu0 %v2410_v12  ;;  %1081 = vmatprep.subr.mxu1 %v2412_v13  ;;  %v3554_v12 = vld [vmem:[#allocation21_spill] sm:$0xff]  ;;  %v3555_v13 = vld [vmem:[#allocation22_spill] sm:$0xff] }
 0x26e   :  { %1011 = vmatpush1.msra.mxu0 %v2416_v14  ;;  %1082 = vmatpush1.msra.mxu1 %v2418_v15  ;;  %v3556_v14 = vld [vmem:[#allocation23_spill] sm:$0xff]  ;;  %v3557_v15 = vld [vmem:[#allocation24_spill] sm:$0xff] }
 0x26f   :  { %1012 = vmatprep.subr.mxu0 %v2420_v16  ;;  %1083 = vmatprep.subr.mxu1 %v2422_v17  ;;  %v3558_v16 = vld [vmem:[#allocation25_spill] sm:$0xff]  ;;  %v3559_v17 = vld [vmem:[#allocation26_spill] sm:$0xff] }
 0x270   :  { %1013 = vmatpush1.msra.mxu0 %v2428_v18  ;;  %1084 = vmatpush1.msra.mxu1 %v2430_v19  ;;  %v3560_v18 = vld [vmem:[#allocation27_spill] sm:$0xff]  ;;  %v3561_v19 = vld [vmem:[#allocation28_spill] sm:$0xff] }
 0x271   :  { %1014 = vmatprep.subr.mxu0 %v2439_v21  ;;  %1085 = vmatprep.subr.mxu1 %v2441_v22  ;;  %v3562_v21 = vld [vmem:[#allocation29_spill] sm:$0xff]  ;;  %v3563_v22 = vld [vmem:[#allocation30_spill] sm:$0xff] }
 0x272   :  { %1015 = vmatpush1.msra.mxu0 %v2445_v23  ;;  %1086 = vmatpush1.msra.mxu1 %v2447_v24  ;;  %v3564_v23 = vmov 0.0   ;;  %v3565_v24 = vld [vmem:[#allocation31_spill] sm:$0xff] }
 0x273   :  { %1016 = vmatprep.subr.mxu0 %v2449_v25  ;;  %1087 = vmatprep.subr.mxu1 %v2451_v26  ;;  %v2914_v25 = vld [vmem:[#allocation5 + $0x1e8] sm:$0xff]  ;;  %v2917_v26 = vld [vmem:[#allocation5 + $0x1f8] sm:$0xff] }
 0x274   :  { %1017 = vmatpush1.msra.mxu0 %v2457_v27  ;;  %1088 = vmatpush1.msra.mxu1 %v2459_v28  ;;  %3566 = vst [vmem:[#allocation12_spill] sm:$0xff] %v2914_v25  ;;  %3567 = vst [vmem:[#allocation13_spill] sm:$0xff] %v2917_v26  ;;  %v3568_v28 = vld [vmem:[#allocation36_spill] sm:$0xff] }
 0x275   :  { %1018 = vmatprep.subr.mxu0 %v2468_v30  ;;  %1089 = vmatprep.subr.mxu1 %v2470_v31 }
 0x276   :  { %1019 = vmatpush1.msra.mxu0 %v2474_v32  ;;  %1090 = vmatpush1.msra.mxu1 %v2476_v33 }
 0x277   :  { %1020 = vmatprep.subr.mxu0 %v2478_v34  ;;  %1091 = vmatprep.subr.mxu1 %v2480_v35 }
 0x278   :  { %1021 = vmatpush1.msra.mxu0 %v2486_v36  ;;  %1092 = vmatpush1.msra.mxu1 %v2488_v37 }
 0x279   :  { %1022 = vmatprep.subr.mxu0 %v2497_v39  ;;  %1093 = vmatprep.subr.mxu1 %v2499_v40 }
 0x27a   :  { %1023 = vmatpush1.msra.mxu0 %v2503_v41  ;;  %1094 = vmatpush1.msra.mxu1 %v2505_v42 }
 0x27b   :  { %1024 = vmatprep.subr.mxu0 %v2507_v43  ;;  %1095 = vmatprep.subr.mxu1 %v2509_v44 }
 0x27c   :  { %1025 = vmatpush1.msra.mxu0 %v2515_v45  ;;  %1096 = vmatpush1.msra.mxu1 %v2517_v46 }
 0x27d   :  { %1026 = vmatprep.subr.mxu0 %v2526_v48  ;;  %1097 = vmatprep.subr.mxu1 %v2528_v49 }
 0x27e   :  { %1027 = vmatpush1.msra.mxu0 %v2532_v50  ;;  %1098 = vmatpush1.msra.mxu1 %v2534_v51 }
 0x27f   :  { %1028 = vmatprep.subr.mxu0 %v3521_v2  ;;  %1099 = vmatprep.subr.mxu1 %v3522_v62 }
 0x280   :  { %1029 = vmatpush1.msra.mxu0 %v3523_v29  ;;  %1100 = vmatpush1.msra.mxu1 %v3548_v5 }
 0x281   :  { %1030 = vmatprep.subr.mxu0 %v3549_v6  ;;  %1101 = vmatprep.subr.mxu1 %v3550_v7 }
 0x282   :  { %1031 = vmatpush1.msra.mxu0 %v3551_v8  ;;  %1102 = vmatpush1.msra.mxu1 %v3552_v9 }
 0x283   :  { %1032 = vmatprep.subr.mxu0 %v3553_v10  ;;  %1103 = vmatprep.subr.mxu1 %v3554_v12 }
 0x284   :  { %1033 = vmatpush1.msra.mxu0 %v3555_v13  ;;  %1104 = vmatpush1.msra.mxu1 %v3556_v14 }
 0x285   :  { %1034 = vmatprep.subr.mxu0 %v3557_v15  ;;  %1105 = vmatprep.subr.mxu1 %v3558_v16 }
 0x286   :  { %1035 = vmatpush1.msra.mxu0 %v3559_v17  ;;  %1106 = vmatpush1.msra.mxu1 %v3560_v18 }
 0x287   :  { %1036 = vmatprep.subr.mxu0 %v3561_v19  ;;  %1107 = vmatprep.subr.mxu1 %v3562_v21 }
 0x288   :  { %1037 = vmatpush1.msra.mxu0 %v3563_v22  ;;  %1070 = vmatprep.mubr.f32.mxu0 %v3564_v23 }
 0x289   :  { %1108 = vmatpush1.msra.mxu1 %v3565_v24  ;;  %1141 = vmatprep.mubr.f32.mxu1 %v3564_v23 }
 0x28a   :  { %1180 = vmatprep.subr.mxu0 %v2914_v25  ;;  %1251 = vmatprep.subr.mxu1 %v2917_v26 }
 0x329   :  { %v898_v27 = vpop.f32.mrf.mxu0  ;;  %v969_v1 = vpop.f32.mrf.mxu1 }
 0x32a   :  { %v974_v30 = vadd.f32 %v898_v27, %v3568_v28  ;;  %v976_v20 = vadd.f32 %v969_v1, %v3570_v59  ;;  %v2928_v1 = vld [vmem:[#allocation5 + $0x1e0] sm:$0xff]  ;;  %v2931_v59 = vld [vmem:[#allocation5 + $0x1f0] sm:$0xff] }
 0x32b   :  { %v900_v31 = vpop.f32.mrf.mxu0  ;;  %v971_v58 = vpop.f32.mrf.mxu1 }
 0x32c   :  { %v1984_v55 = vmul.f32 -1.442695, %v974_v30  ;;  %v975_v0 = vadd.f32 %v900_v31, %v3569_v47  ;;  %v1986_v56 = vmul.f32 -1.442695, %v976_v20  ;;  %v977_v61 = vadd.f32 %v971_v58, %v3571_v53  ;;  %v2934_v20 = vld [vmem:[#allocation5 + $0x1c8] sm:$0xff]  ;;  %v2940_v58 = vld [vmem:[#allocation5 + $0x1c0] sm:$0xff] }
 0x32d   :  { %v2946_v53 = vld [vmem:[#allocation5 + $0x1a8] sm:$0xff] }
 0x32e   :  { %2097 = vpow2.f32 %v1984_v55  ;;  %v1985_v60 = vmul.f32 -1.442695, %v975_v0 }
 0x330   :  { %2099 = vpow2.f32 %v1985_v60 }
 0x331   :  { %2101 = vpow2.f32 %v1986_v56  ;;  %v2943_v56 = vld [vmem:[#allocation5 + $0x1d0] sm:$0xff] }
 0x332   :  { %2103 = vtanh.f32 %v977_v61  ;;  %v2949_v61 = vld [vmem:[#allocation5 + $0x1b8] sm:$0xff] }
 0x33b   :  { %v2098_v52 = vpop.eup %2097 }
 0x33c   :  { %v987_v4 = vadd.f32 1.0, %v2098_v52  ;;  %v2952_v52 = vld [vmem:[#allocation5 + $0x1a0] sm:$0xff] }
 0x33d   :  { %v2100_v38 = vpop.eup %2099 }
 0x33e   :  { %2105 = vrcp.f32 %v987_v4  ;;  %v988_v11 = vadd.f32 1.0, %v2100_v38  ;;  %v2102_v63 = vpop.eup %2101  ;;  %v2955_v4 = vld [vmem:[#allocation5 + $0x1b0] sm:$0xff]  ;;  %v2958_v38 = vld [vmem:[#allocation5 + $0x188] sm:$0xff] }
 0x33f   :  { %v2104_v3 = vpop.eup %2103  ;;  %v989_v30 = vadd.f32 1.0, %v2102_v63  ;;  %v2964_v63 = vld [vmem:[#allocation5 + $0x180] sm:$0xff] }
 0x340   :  { %2107 = vrcp.f32 %v988_v11  ;;  %v2961_v11 = vld [vmem:[#allocation5 + $0x198] sm:$0xff] }
 0x341   :  { %2109 = vrcp.f32 %v989_v30  ;;  %v2979_v30 = vld [vmem:[#allocation5 + $0x170] sm:$0xff] }
 0x342   :  { %3573 = vst [vmem:[#allocation10_spill] sm:$0xff] %v2979_v30 }
 0x34b   :  { %v2106_v54 = vpop.eup %2105 }
 0x34c   :  { %v998_v27 = vmul.f32 %v2106_v54, %v2104_v3  ;;  %v2967_v3 = vld [vmem:[#allocation5 + $0x190] sm:$0xff]  ;;  %v2970_v54 = vld [vmem:[#allocation5 + $0x168] sm:$0xff] }
 0x34d   :  { %v2108_v28 = vpop.eup %2107 }
 0x34e   :  { %v997_v31 = vmul.f32 %v2108_v28, %v2847_v57  ;;  %v2110_v47 = vpop.eup %2109  ;;  %v2937_v57 = vld [vmem:[#allocation5 + $0x1d8] sm:$0xff]  ;;  %v2976_v28 = vld [vmem:[#allocation5 + $0x160] sm:$0xff] }
 0x34f   :  { %3572 = vst [vmem:[#allocation14_spill] sm:$0xff] %v2976_v28 }
 0x350   :  { %v2925_v55 = vadd.f32 %v998_v27, %v997_v31  ;;  %v2973_v27 = vld [vmem:[#allocation5 + $0x178] sm:$0xff]  ;;  %v2982_v31 = vld [vmem:[#allocation5 + $0x148] sm:$0xff] }
 0x352   :  { %2111 = vtanh.f32 %v2925_v55 }
 0x35f   :  { %v2112_v0 = vpop.eup %2111 }
 0x360   :  { %v1001_v60 = vmul.f32 %v2112_v0, %v2110_v47  ;;  %v2985_v47 = vld [vmem:[#allocation5 + $0x158] sm:$0xff]  ;;  %v2988_v0 = vld [vmem:[#allocation5 + $0x140] sm:$0xff] }
 0x362   :  { %1071 = vmatmul.mubr.f32.vlgmr.msra.gmra.mxu0 %v1001_v60  ;;  %1142 = vmatmul.mubr.f32.vlgmr.msra.gmra.mxu1 %v1001_v60  ;;  %v2991_v60 = vld [vmem:[#allocation5 + $0x150] sm:$0xff] }
 0x363   :  { %1181 = vmatpush1.msra.mxu0 %v2928_v1  ;;  %1252 = vmatpush1.msra.mxu1 %v2931_v59 }
 0x364   :  { %1182 = vmatprep.subr.mxu0 %v2934_v20  ;;  %1253 = vmatprep.subr.mxu1 %v2937_v57 }
 0x365   :  { %1183 = vmatpush1.msra.mxu0 %v2940_v58  ;;  %1254 = vmatpush1.msra.mxu1 %v2943_v56 }
 0x366   :  { %1184 = vmatprep.subr.mxu0 %v2946_v53  ;;  %1255 = vmatprep.subr.mxu1 %v2949_v61 }
 0x367   :  { %1185 = vmatpush1.msra.mxu0 %v2952_v52  ;;  %1256 = vmatpush1.msra.mxu1 %v2955_v4 }
 0x368   :  { %1186 = vmatprep.subr.mxu0 %v2958_v38  ;;  %1257 = vmatprep.subr.mxu1 %v2961_v11 }
 0x369   :  { %1187 = vmatpush1.msra.mxu0 %v2964_v63  ;;  %1258 = vmatpush1.msra.mxu1 %v2967_v3 }
 0x36a   :  { %1188 = vmatprep.subr.mxu0 %v2970_v54  ;;  %1259 = vmatprep.subr.mxu1 %v2973_v27 }
 0x36b   :  { %1189 = vmatpush1.msra.mxu0 %v2976_v28  ;;  %1260 = vmatpush1.msra.mxu1 %v2979_v30  ;;  %v2994_v28 = vld [vmem:[#allocation5 + $0x128] sm:$0xff]  ;;  %v2997_v30 = vld [vmem:[#allocation5 + $0x138] sm:$0xff] }
 0x36c   :  { %1190 = vmatprep.subr.mxu0 %v2982_v31  ;;  %1261 = vmatprep.subr.mxu1 %v2985_v47 }
 0x36d   :  { %1191 = vmatpush1.msra.mxu0 %v2988_v0  ;;  %1262 = vmatpush1.msra.mxu1 %v2991_v60 }
 0x36e   :  { %1192 = vmatprep.subr.mxu0 %v2994_v28  ;;  %1263 = vmatprep.subr.mxu1 %v2997_v30 }
 0x36f   :  { %1193 = vmatpush1.msra.mxu0 %v2474_v32  ;;  %1264 = vmatpush1.msra.mxu1 %v2476_v33  ;;  %v3574_v33 = vld [vmem:[#allocation40_spill] sm:$0xff] }
 0x370   :  { %1194 = vmatprep.subr.mxu0 %v2478_v34  ;;  %1265 = vmatprep.subr.mxu1 %v2480_v35 }
 0x371   :  { %1195 = vmatpush1.msra.mxu0 %v2486_v36  ;;  %1266 = vmatpush1.msra.mxu1 %v2488_v37  ;;  %v3575_v37 = vld [vmem:[#allocation42_spill] sm:$0xff] }
 0x372   :  { %1196 = vmatprep.subr.mxu0 %v2497_v39  ;;  %1267 = vmatprep.subr.mxu1 %v2499_v40 }
 0x373   :  { %1197 = vmatpush1.msra.mxu0 %v2503_v41  ;;  %1268 = vmatpush1.msra.mxu1 %v2505_v42  ;;  %v3576_v42 = vld [vmem:[#allocation41_spill] sm:$0xff] }
 0x374   :  { %1198 = vmatprep.subr.mxu0 %v2507_v43  ;;  %1269 = vmatprep.subr.mxu1 %v2509_v44 }
 0x375   :  { %1199 = vmatpush1.msra.mxu0 %v2515_v45  ;;  %1270 = vmatpush1.msra.mxu1 %v2517_v46  ;;  %v3577_v46 = vld [vmem:[#allocation43_spill] sm:$0xff] }
 0x376   :  { %1200 = vmatprep.subr.mxu0 %v2526_v48  ;;  %1271 = vmatprep.subr.mxu1 %v2528_v49 }
 0x377   :  { %1201 = vmatpush1.msra.mxu0 %v2532_v50  ;;  %1272 = vmatpush1.msra.mxu1 %v2534_v51 }
 0x378   :  { %1202 = vmatprep.subr.mxu0 %v3521_v2  ;;  %1273 = vmatprep.subr.mxu1 %v3522_v62 }
 0x379   :  { %1203 = vmatpush1.msra.mxu0 %v3523_v29  ;;  %1274 = vmatpush1.msra.mxu1 %v3548_v5 }
 0x37a   :  { %1204 = vmatprep.subr.mxu0 %v3549_v6  ;;  %1275 = vmatprep.subr.mxu1 %v3550_v7 }
 0x37b   :  { %1205 = vmatpush1.msra.mxu0 %v3551_v8  ;;  %1276 = vmatpush1.msra.mxu1 %v3552_v9 }
 0x37c   :  { %1206 = vmatprep.subr.mxu0 %v3553_v10  ;;  %1277 = vmatprep.subr.mxu1 %v3554_v12 }
 0x37d   :  { %1207 = vmatpush1.msra.mxu0 %v3555_v13  ;;  %1278 = vmatpush1.msra.mxu1 %v3556_v14 }
 0x37e   :  { %1208 = vmatprep.subr.mxu0 %v3557_v15  ;;  %1279 = vmatprep.subr.mxu1 %v3558_v16  ;;  %v3578_v15 = vld [vmem:[#allocation14_spill] sm:$0xff] }
 0x37f   :  { %1209 = vmatpush1.msra.mxu0 %v3559_v17  ;;  %1280 = vmatpush1.msra.mxu1 %v3560_v18  ;;  %v3579_v16 = vld [vmem:[#allocation10_spill] sm:$0xff]  ;;  %v3077_v18 = vld [vmem:[#allocation5 + $0x130] sm:$0xff] }
 0x380   :  { %1210 = vmatprep.subr.mxu0 %v3561_v19  ;;  %1281 = vmatprep.subr.mxu1 %v3562_v21  ;;  %v3074_v17 = vld [vmem:[#allocation5 + $0x120] sm:$0xff]  ;;  %v3080_v19 = vld [vmem:[#allocation5 + $0x108] sm:$0xff]  ;;  %v3083_v21 = vld [vmem:[#allocation5 + $0x118] sm:$0xff] }
 0x381   :  { %1211 = vmatpush1.msra.mxu0 %v3563_v22  ;;  %1244 = vmatprep.mubr.f32.mxu0 %v3564_v23  ;;  %v3086_v22 = vld [vmem:[#allocation5 + $0x100] sm:$0xff] }
 0x382   :  { %1282 = vmatpush1.msra.mxu1 %v3565_v24  ;;  %1315 = vmatprep.mubr.f32.mxu1 %v3564_v23  ;;  %v3089_v24 = vld [vmem:[#allocation5 + $0x110] sm:$0xff] }
 0x383   :  { %1354 = vmatprep.subr.mxu0 %v2914_v25  ;;  %1425 = vmatprep.subr.mxu1 %v2917_v26 }
 0x422   :  { %v1072_v32 = vpop.f32.mrf.mxu0  ;;  %v1143_v41 = vpop.f32.mrf.mxu1 }
 0x423   :  { %v1148_v34 = vadd.f32 %v1072_v32, %v3574_v33  ;;  %v1150_v43 = vadd.f32 %v1143_v41, %v3576_v42  ;;  %v3095_v32 = vld [vmem:[#allocation5 + $0xf8] sm:$0xff]  ;;  %v3098_v33 = vld [vmem:[#allocation5 + $0xe0] sm:$0xff] }
 0x424   :  { %v1074_v35 = vpop.f32.mrf.mxu0  ;;  %v1145_v44 = vpop.f32.mrf.mxu1  ;;  %v3119_v41 = vld [vmem:[#allocation5 + $0xb8] sm:$0xff]  ;;  %v3122_v42 = vld [vmem:[#allocation5 + $0xa0] sm:$0xff] }
 0x425   :  { %v1987_v36 = vmul.f32 -1.442695, %v1148_v34  ;;  %v1149_v39 = vadd.f32 %v1074_v35, %v3575_v37  ;;  %v1989_v45 = vmul.f32 -1.442695, %v1150_v43  ;;  %v1151_v48 = vadd.f32 %v1145_v44, %v3577_v46  ;;  %v3101_v34 = vld [vmem:[#allocation5 + $0xf0] sm:$0xff]  ;;  %v3104_v35 = vld [vmem:[#allocation5 + $0xc8] sm:$0xff] }
 0x426   :  { %v3110_v37 = vld [vmem:[#allocation5 + $0xc0] sm:$0xff]  ;;  %v3125_v43 = vld [vmem:[#allocation5 + $0xb0] sm:$0xff]  ;;  %v3128_v44 = vld [vmem:[#allocation5 + $0x88] sm:$0xff] }
 0x427   :  { %2113 = vpow2.f32 %v1987_v36  ;;  %v1988_v40 = vmul.f32 -1.442695, %v1149_v39  ;;  %v3107_v36 = vld [vmem:[#allocation5 + $0xd8] sm:$0xff]  ;;  %v3113_v39 = vld [vmem:[#allocation5 + $0xd0] sm:$0xff]  ;;  %v3134_v46 = vld [vmem:[#allocation5 + $0x80] sm:$0xff] }
 0x429   :  { %2115 = vpow2.f32 %v1988_v40  ;;  %v3116_v40 = vld [vmem:[#allocation5 + $0xa8] sm:$0xff] }
 0x42a   :  { %2117 = vpow2.f32 %v1989_v45  ;;  %v3131_v45 = vld [vmem:[#allocation5 + $0x98] sm:$0xff] }
 0x42b   :  { %2119 = vtanh.f32 %v1151_v48  ;;  %v3137_v48 = vld [vmem:[#allocation5 + $0x90] sm:$0xff] }
 0x42c   :  { %3580 = vst [vmem:[#allocation11_spill] sm:$0xff] %v3137_v48 }
 0x434   :  { %v2114_v49 = vpop.eup %2113 }
 0x435   :  { %v1161_v50 = vadd.f32 1.0, %v2114_v49  ;;  %v3140_v49 = vld [vmem:[#allocation5 + $0x68] sm:$0xff] }
 0x436   :  { %v2116_v51 = vpop.eup %2115  ;;  %3581 = vst [vmem:[#allocation32_spill] sm:$0xff] %v3140_v49 }
 0x437   :  { %2121 = vrcp.f32 %v1161_v50  ;;  %v1162_v2 = vadd.f32 1.0, %v2116_v51  ;;  %v2118_v62 = vpop.eup %2117  ;;  %v3143_v50 = vld [vmem:[#allocation5 + $0x78] sm:$0xff]  ;;  %v3146_v51 = vld [vmem:[#allocation5 + $0x60] sm:$0xff] }
 0x438   :  { %v2120_v29 = vpop.eup %2119  ;;  %v1163_v8 = vadd.f32 1.0, %v2118_v62  ;;  %3582 = vst [vmem:[#allocation34_spill] sm:$0xff] %v3143_v50  ;;  %3583 = vst [vmem:[#allocation33_spill] sm:$0xff] %v3146_v51  ;;  %v3152_v62 = vld [vmem:[#allocation5 + $0x48] sm:$0xff] }
 0x439   :  { %2123 = vrcp.f32 %v1162_v2  ;;  %v3149_v2 = vld [vmem:[#allocation5 + $0x70] sm:$0xff]  ;;  %3585 = vst [vmem:[#allocation15_spill] sm:$0xff] %v3152_v62 }
 0x43a   :  { %2125 = vrcp.f32 %v1163_v8  ;;  %3584 = vst [vmem:[#allocation35_spill] sm:$0xff] %v3149_v2  ;;  %v3167_v8 = vld [vmem:[#allocation5 + $0x38] sm:$0xff] }
 0x43b   :  { %3590 = vst [vmem:[#allocation20_spill] sm:$0xff] %v3167_v8 }
 0x444   :  { %v2122_v5 = vpop.eup %2121 }
 0x445   :  { %v1172_v6 = vmul.f32 %v2122_v5, %v2120_v29  ;;  %v3155_v29 = vld [vmem:[#allocation5 + $0x58] sm:$0xff]  ;;  %v3158_v5 = vld [vmem:[#allocation5 + $0x40] sm:$0xff] }
 0x446   :  { %v2124_v7 = vpop.eup %2123  ;;  %3586 = vst [vmem:[#allocation16_spill] sm:$0xff] %v3155_v29  ;;  %3587 = vst [vmem:[#allocation17_spill] sm:$0xff] %v3158_v5 }
 0x447   :  { %v1171_v9 = vmul.f32 %v2124_v7, %v2925_v55  ;;  %v2126_v12 = vpop.eup %2125  ;;  %v3092_v55 = vld [vmem:[#allocation5 + $0xe8] sm:$0xff] }
 0x448   :  { %v3164_v7 = vld [vmem:[#allocation5 + $0x28] sm:$0xff] }
 0x449   :  { %v3047_v10 = vadd.f32 %v1172_v6, %v1171_v9  ;;  %v3161_v6 = vld [vmem:[#allocation5 + $0x50] sm:$0xff]  ;;  %3589 = vst [vmem:[#allocation19_spill] sm:$0xff] %v3164_v7  ;;  %v3170_v9 = vld [vmem:[#allocation5 + $0x20] sm:$0xff] }
 0x44a   :  { %3588 = vst [vmem:[#allocation18_spill] sm:$0xff] %v3161_v6  ;;  %3591 = vst [vmem:[#allocation21_spill] sm:$0xff] %v3170_v9 }
 0x44b   :  { %2127 = vtanh.f32 %v3047_v10 }
 0x458   :  { %v2128_v13 = vpop.eup %2127 }
 0x459   :  { %v1175_v14 = vmul.f32 %v2128_v13, %v2126_v12  ;;  %v3173_v12 = vld [vmem:[#allocation5 + $0x30] sm:$0xff]  ;;  %v3176_v13 = vld [vmem:[#allocation5 + $0x8] sm:$0xff] }
 0x45a   :  { %3592 = vst [vmem:[#allocation22_spill] sm:$0xff] %v3173_v12  ;;  %3593 = vst [vmem:[#allocation23_spill] sm:$0xff] %v3176_v13 }
 0x45b   :  { %1245 = vmatmul.mubr.f32.vlgmr.msra.gmra.mxu0 %v1175_v14  ;;  %1316 = vmatmul.mubr.f32.vlgmr.msra.gmra.mxu1 %v1175_v14  ;;  %v3179_v14 = vld [vmem:[#allocation5 + $0x18] sm:$0xff] }
 0x45c   :  { %1355 = vmatpush1.msra.mxu0 %v2928_v1  ;;  %1426 = vmatpush1.msra.mxu1 %v2931_v59  ;;  %3594 = vst [vmem:[#allocation24_spill] sm:$0xff] %v3179_v14 }
 0x45d   :  { %1356 = vmatprep.subr.mxu0 %v2934_v20  ;;  %1427 = vmatprep.subr.mxu1 %v2937_v57 }
 0x45e   :  { %1357 = vmatpush1.msra.mxu0 %v2940_v58  ;;  %1428 = vmatpush1.msra.mxu1 %v2943_v56 }
 0x45f   :  { %1358 = vmatprep.subr.mxu0 %v2946_v53  ;;  %1429 = vmatprep.subr.mxu1 %v2949_v61 }
 0x460   :  { %1359 = vmatpush1.msra.mxu0 %v2952_v52  ;;  %1430 = vmatpush1.msra.mxu1 %v2955_v4 }
 0x461   :  { %1360 = vmatprep.subr.mxu0 %v2958_v38  ;;  %1431 = vmatprep.subr.mxu1 %v2961_v11 }
 0x462   :  { %1361 = vmatpush1.msra.mxu0 %v2964_v63  ;;  %1432 = vmatpush1.msra.mxu1 %v2967_v3 }
 0x463   :  { %1362 = vmatprep.subr.mxu0 %v2970_v54  ;;  %1433 = vmatprep.subr.mxu1 %v2973_v27 }
 0x464   :  { %1363 = vmatpush1.msra.mxu0 %v3578_v15  ;;  %1434 = vmatpush1.msra.mxu1 %v3579_v16 }
 0x465   :  { %1364 = vmatprep.subr.mxu0 %v2982_v31  ;;  %1435 = vmatprep.subr.mxu1 %v2985_v47 }
 0x466   :  { %1365 = vmatpush1.msra.mxu0 %v2988_v0  ;;  %1436 = vmatpush1.msra.mxu1 %v2991_v60 }
 0x467   :  { %1366 = vmatprep.subr.mxu0 %v2994_v28  ;;  %1437 = vmatprep.subr.mxu1 %v2997_v30 }
 0x468   :  { %1367 = vmatpush1.msra.mxu0 %v3074_v17  ;;  %1438 = vmatpush1.msra.mxu1 %v3077_v18 }
 0x469   :  { %1368 = vmatprep.subr.mxu0 %v3080_v19  ;;  %1439 = vmatprep.subr.mxu1 %v3083_v21 }
 0x46a   :  { %1369 = vmatpush1.msra.mxu0 %v3086_v22  ;;  %1440 = vmatpush1.msra.mxu1 %v3089_v24 }
 0x46b   :  { %1370 = vmatprep.subr.mxu0 %v3092_v55  ;;  %1441 = vmatprep.subr.mxu1 %v3095_v32 }
 0x46c   :  { %1371 = vmatpush1.msra.mxu0 %v3098_v33  ;;  %1442 = vmatpush1.msra.mxu1 %v3101_v34 }
 0x46d   :  { %1372 = vmatprep.subr.mxu0 %v3104_v35  ;;  %1443 = vmatprep.subr.mxu1 %v3107_v36 }
 0x46e   :  { %1373 = vmatpush1.msra.mxu0 %v3110_v37  ;;  %1444 = vmatpush1.msra.mxu1 %v3113_v39 }
 0x46f   :  { %1374 = vmatprep.subr.mxu0 %v3116_v40  ;;  %1445 = vmatprep.subr.mxu1 %v3119_v41 }
 0x470   :  { %1375 = vmatpush1.msra.mxu0 %v3122_v42  ;;  %1446 = vmatpush1.msra.mxu1 %v3125_v43 }
 0x471   :  { %1376 = vmatprep.subr.mxu0 %v3128_v44  ;;  %1447 = vmatprep.subr.mxu1 %v3131_v45 }
 0x472   :  { %1377 = vmatpush1.msra.mxu0 %v3134_v46  ;;  %1448 = vmatpush1.msra.mxu1 %v3137_v48 }
 0x473   :  { %1378 = vmatprep.subr.mxu0 %v3140_v49  ;;  %1449 = vmatprep.subr.mxu1 %v3143_v50 }
 0x474   :  { %1379 = vmatpush1.msra.mxu0 %v3146_v51  ;;  %1450 = vmatpush1.msra.mxu1 %v3149_v2  ;;  %v3599_v2 = vld [vmem:[#allocation45_spill] sm:$0xff] }
 0x475   :  { %1380 = vmatprep.subr.mxu0 %v3152_v62  ;;  %1451 = vmatprep.subr.mxu1 %v3155_v29 }
 0x476   :  { %1381 = vmatpush1.msra.mxu0 %v3158_v5  ;;  %1452 = vmatpush1.msra.mxu1 %v3161_v6  ;;  %v3598_v5 = vld [vmem:[#allocation46_spill] sm:$0xff] }
 0x477   :  { %1382 = vmatprep.subr.mxu0 %v3164_v7  ;;  %1453 = vmatprep.subr.mxu1 %v3167_v8  ;;  %v3182_v7 = vld [vmem:[#allocation5] sm:$0xff]  ;;  %v3186_v8 = vld [vmem:[#allocation5 + $0x10] sm:$0xff] }
 0x478   :  { %1383 = vmatpush1.msra.mxu0 %v3170_v9  ;;  %1454 = vmatpush1.msra.mxu1 %v3173_v12  ;;  %3595 = vst [vmem:[#allocation25_spill] sm:$0xff] %v3182_v7  ;;  %3596 = vst [vmem:[#allocation26_spill] sm:$0xff] %v3186_v8  ;;  %v3597_v12 = vld [vmem:[#allocation44_spill] sm:$0xff] }
 0x479   :  { %1384 = vmatprep.subr.mxu0 %v3176_v13  ;;  %1455 = vmatprep.subr.mxu1 %v3179_v14 }
 0x47a   :  { %1385 = vmatpush1.msra.mxu0 %v3182_v7  ;;  %1418 = vmatprep.mubr.f32.mxu0 %v3564_v23 }
 0x47b   :  { %1456 = vmatpush1.msra.mxu1 %v3186_v8  ;;  %1489 = vmatprep.mubr.f32.mxu1 %v3564_v23  ;;  %v3600_v23 = vld [vmem:[#allocation47_spill] sm:$0xff] }
 0x47c   :  { %1528 = vmatprep.subr.mxu0 %v2914_v25  ;;  %1599 = vmatprep.subr.mxu1 %v2917_v26 }
 0x51b   :  { %v1246_v13 = vpop.f32.mrf.mxu0  ;;  %v1317_v62 = vpop.f32.mrf.mxu1 }
 0x51c   :  { %v1322_v9 = vadd.f32 %v1246_v13, %v3597_v12  ;;  %v1324_v51 = vadd.f32 %v1317_v62, %v3599_v2 }
 0x51d   :  { %v1248_v14 = vpop.f32.mrf.mxu0  ;;  %v1319_v8 = vpop.f32.mrf.mxu1 }
 0x51e   :  { %v1990_v6 = vmul.f32 -1.442695, %v1322_v9  ;;  %v1323_v29 = vadd.f32 %v1248_v14, %v3598_v5  ;;  %v1992_v50 = vmul.f32 -1.442695, %v1324_v51  ;;  %v1325_v49 = vadd.f32 %v1319_v8, %v3600_v23  ;;  %v3605_v51 = vld [vmem:[#allocation35_spill] sm:$0xff]  ;;  %v3607_v14 = vld [vmem:[#allocation16_spill] sm:$0xff] }
 0x51f   :  { %v3606_v8 = vld [vmem:[#allocation15_spill] sm:$0xff] }
 0x520   :  { %2129 = vpow2.f32 %v1990_v6  ;;  %v1991_v7 = vmul.f32 -1.442695, %v1323_v29 }
 0x522   :  { %2131 = vpow2.f32 %v1991_v7 }
 0x523   :  { %2133 = vpow2.f32 %v1992_v50 }
 0x524   :  { %2135 = vtanh.f32 %v1325_v49  ;;  %v3604_v49 = vld [vmem:[#allocation33_spill] sm:$0xff] }
 0x52d   :  { %v2130_v25 = vpop.eup %2129 }
 0x52e   :  { %v1335_v48 = vadd.f32 1.0, %v2130_v25 }
 0x52f   :  { %v2132_v26 = vpop.eup %2131 }
 0x530   :  { %2137 = vrcp.f32 %v1335_v48  ;;  %v1336_v12 = vadd.f32 1.0, %v2132_v26  ;;  %v2134_v9 = vpop.eup %2133  ;;  %v3601_v26 = vld [vmem:[#allocation11_spill] sm:$0xff]  ;;  %v3603_v48 = vld [vmem:[#allocation34_spill] sm:$0xff] }
 0x531   :  { %v2136_v5 = vpop.eup %2135  ;;  %v1337_v13 = vadd.f32 1.0, %v2134_v9  ;;  %v3609_v9 = vld [vmem:[#allocation18_spill] sm:$0xff] }
 0x532   :  { %2139 = vrcp.f32 %v1336_v12  ;;  %v3608_v12 = vld [vmem:[#allocation17_spill] sm:$0xff] }
 0x533   :  { %2141 = vrcp.f32 %v1337_v13  ;;  %v3614_v13 = vld [vmem:[#allocation23_spill] sm:$0xff] }
 0x53d   :  { %v2138_v6 = vpop.eup %2137 }
 0x53e   :  { %v1346_v29 = vmul.f32 %v2138_v6, %v2136_v5  ;;  %v3610_v5 = vld [vmem:[#allocation19_spill] sm:$0xff]  ;;  %v3611_v6 = vld [vmem:[#allocation20_spill] sm:$0xff] }
 0x53f   :  { %v2140_v7 = vpop.eup %2139 }
 0x540   :  { %v1345_v2 = vmul.f32 %v2140_v7, %v3047_v10  ;;  %v2142_v23 = vpop.eup %2141  ;;  %v3602_v10 = vld [vmem:[#allocation32_spill] sm:$0xff]  ;;  %v3613_v7 = vld [vmem:[#allocation22_spill] sm:$0xff] }
 0x542   :  { %v3197_v62 = vadd.f32 %v1346_v29, %v1345_v2  ;;  %v3612_v29 = vld [vmem:[#allocation21_spill] sm:$0xff]  ;;  %v3615_v2 = vld [vmem:[#allocation24_spill] sm:$0xff] }
 0x544   :  { %2143 = vtanh.f32 %v3197_v62 }
 0x551   :  { %v2144_v25 = vpop.eup %2143 }
 0x552   :  { %v1349_v50 = vmul.f32 %v2144_v25, %v2142_v23  ;;  %v3616_v23 = vld [vmem:[#allocation25_spill] sm:$0xff]  ;;  %v3617_v25 = vmov 0.0  }
 0x554   :  { %1419 = vmatmul.mubr.f32.vlgmr.msra.gmra.mxu0 %v1349_v50  ;;  %1490 = vmatmul.mubr.f32.vlgmr.msra.gmra.mxu1 %v1349_v50  ;;  %v3618_v50 = vld [vmem:[#allocation26_spill] sm:$0xff] }
 0x555   :  { %1529 = vmatpush1.msra.mxu0 %v2928_v1  ;;  %1600 = vmatpush1.msra.mxu1 %v2931_v59 }
 0x556   :  { %1530 = vmatprep.subr.mxu0 %v2934_v20  ;;  %1601 = vmatprep.subr.mxu1 %v2937_v57 }
 0x557   :  { %1531 = vmatpush1.msra.mxu0 %v2940_v58  ;;  %1602 = vmatpush1.msra.mxu1 %v2943_v56 }
 0x558   :  { %1532 = vmatprep.subr.mxu0 %v2946_v53  ;;  %1603 = vmatprep.subr.mxu1 %v2949_v61 }
 0x559   :  { %1533 = vmatpush1.msra.mxu0 %v2952_v52  ;;  %1604 = vmatpush1.msra.mxu1 %v2955_v4 }
 0x55a   :  { %1534 = vmatprep.subr.mxu0 %v2958_v38  ;;  %1605 = vmatprep.subr.mxu1 %v2961_v11 }
 0x55b   :  { %1535 = vmatpush1.msra.mxu0 %v2964_v63  ;;  %1606 = vmatpush1.msra.mxu1 %v2967_v3 }
 0x55c   :  { %1536 = vmatprep.subr.mxu0 %v2970_v54  ;;  %1607 = vmatprep.subr.mxu1 %v2973_v27 }
 0x55d   :  { %1537 = vmatpush1.msra.mxu0 %v3578_v15  ;;  %1608 = vmatpush1.msra.mxu1 %v3579_v16 }
 0x55e   :  { %1538 = vmatprep.subr.mxu0 %v2982_v31  ;;  %1609 = vmatprep.subr.mxu1 %v2985_v47 }
 0x55f   :  { %1539 = vmatpush1.msra.mxu0 %v2988_v0  ;;  %1610 = vmatpush1.msra.mxu1 %v2991_v60 }
 0x560   :  { %1540 = vmatprep.subr.mxu0 %v2994_v28  ;;  %1611 = vmatprep.subr.mxu1 %v2997_v30 }
 0x561   :  { %1541 = vmatpush1.msra.mxu0 %v3074_v17  ;;  %1612 = vmatpush1.msra.mxu1 %v3077_v18 }
 0x562   :  { %1542 = vmatprep.subr.mxu0 %v3080_v19  ;;  %1613 = vmatprep.subr.mxu1 %v3083_v21 }
 0x563   :  { %1543 = vmatpush1.msra.mxu0 %v3086_v22  ;;  %1614 = vmatpush1.msra.mxu1 %v3089_v24 }
 0x564   :  { %1544 = vmatprep.subr.mxu0 %v3092_v55  ;;  %1615 = vmatprep.subr.mxu1 %v3095_v32 }
 0x565   :  { %1545 = vmatpush1.msra.mxu0 %v3098_v33  ;;  %1616 = vmatpush1.msra.mxu1 %v3101_v34 }
 0x566   :  { %1546 = vmatprep.subr.mxu0 %v3104_v35  ;;  %1617 = vmatprep.subr.mxu1 %v3107_v36 }
 0x567   :  { %1547 = vmatpush1.msra.mxu0 %v3110_v37  ;;  %1618 = vmatpush1.msra.mxu1 %v3113_v39 }
 0x568   :  { %1548 = vmatprep.subr.mxu0 %v3116_v40  ;;  %1619 = vmatprep.subr.mxu1 %v3119_v41 }
 0x569   :  { %1549 = vmatpush1.msra.mxu0 %v3122_v42  ;;  %1620 = vmatpush1.msra.mxu1 %v3125_v43 }
 0x56a   :  { %1550 = vmatprep.subr.mxu0 %v3128_v44  ;;  %1621 = vmatprep.subr.mxu1 %v3131_v45 }
 0x56b   :  { %1551 = vmatpush1.msra.mxu0 %v3134_v46  ;;  %1622 = vmatpush1.msra.mxu1 %v3601_v26 }
 0x56c   :  { %1552 = vmatprep.subr.mxu0 %v3602_v10  ;;  %1623 = vmatprep.subr.mxu1 %v3603_v48 }
 0x56d   :  { %1553 = vmatpush1.msra.mxu0 %v3604_v49  ;;  %1624 = vmatpush1.msra.mxu1 %v3605_v51  ;;  %v3623_v51 = vld [vmem:[#allocation49_spill] sm:$0xff] }
 0x56e   :  { %1554 = vmatprep.subr.mxu0 %v3606_v8  ;;  %1625 = vmatprep.subr.mxu1 %v3607_v14 }
 0x56f   :  { %1555 = vmatpush1.msra.mxu0 %v3608_v12  ;;  %1626 = vmatpush1.msra.mxu1 %v3609_v9  ;;  %v3619_v9 = vld [vmem:[#allocation12_spill] sm:$0xff] }
 0x570   :  { %1556 = vmatprep.subr.mxu0 %v3610_v5  ;;  %1627 = vmatprep.subr.mxu1 %v3611_v6  ;;  %v3620_v5 = vld [vmem:[#allocation13_spill] sm:$0xff] }
 0x571   :  { %1557 = vmatpush1.msra.mxu0 %v3612_v29  ;;  %1628 = vmatpush1.msra.mxu1 %v3613_v7  ;;  %v3621_v29 = vld [vmem:[#allocation48_spill] sm:$0xff] }
 0x572   :  { %1558 = vmatprep.subr.mxu0 %v3614_v13  ;;  %1629 = vmatprep.subr.mxu1 %v3615_v2  ;;  %v3622_v13 = vld [vmem:[#allocation50_spill] sm:$0xff] }
 0x573   :  { %1559 = vmatpush1.msra.mxu0 %v3616_v23  ;;  %1592 = vmatprep.mubr.f32.mxu0 %v3617_v25 }
 0x574   :  { %1630 = vmatpush1.msra.mxu1 %v3618_v50  ;;  %1663 = vmatprep.mubr.f32.mxu1 %v3617_v25  ;;  %v3624_v25 = vld [vmem:[#allocation51_spill] sm:$0xff] }
 0x575   :  { %1702 = vmatprep.subr.mxu0 %v3619_v9  ;;  %1773 = vmatprep.subr.mxu1 %v3620_v5 }
 0x614   :  { %v1420_v6 = vpop.f32.mrf.mxu0  ;;  %v1491_v23 = vpop.f32.mrf.mxu1 }
 0x615   :  { %v1496_v12 = vadd.f32 %v1420_v6, %v3621_v29  ;;  %v1498_v49 = vadd.f32 %v1491_v23, %v3623_v51 }
 0x616   :  { %v1422_v7 = vpop.f32.mrf.mxu0  ;;  %v1493_v50 = vpop.f32.mrf.mxu1 }
 0x617   :  { %v1993_v14 = vmul.f32 -1.442695, %v1496_v12  ;;  %v1497_v8 = vadd.f32 %v1422_v7, %v3622_v13  ;;  %v1995_v48 = vmul.f32 -1.442695, %v1498_v49  ;;  %v1499_v10 = vadd.f32 %v1493_v50, %v3624_v25  ;;  %v1887_v25 = vld [vmem:[#allocation7 + $0x78] sm:$0xff]  ;;  %v1886_v50 = vld [vmem:[#allocation7 + $0x70] sm:$0xff] }
 0x619   :  { %2145 = vpow2.f32 %v1993_v14  ;;  %v1994_v2 = vmul.f32 -1.442695, %v1497_v8 }
 0x61b   :  { %2147 = vpow2.f32 %v1994_v2 }
 0x61c   :  { %2149 = vpow2.f32 %v1995_v48 }
 0x61d   :  { %2151 = vtanh.f32 %v1499_v10 }
 0x626   :  { %v2146_v9 = vpop.eup %2145 }
 0x627   :  { %v1509_v26 = vadd.f32 1.0, %v2146_v9  ;;  %v1885_v9 = vld [vmem:[#allocation7 + $0x68] sm:$0xff] }
 0x628   :  { %v2148_v5 = vpop.eup %2147 }
 0x629   :  { %2153 = vrcp.f32 %v1509_v26  ;;  %v1510_v6 = vadd.f32 1.0, %v2148_v5  ;;  %v2150_v12 = vpop.eup %2149  ;;  %v1884_v5 = vld [vmem:[#allocation7 + $0x60] sm:$0xff] }
 0x62a   :  { %v2152_v29 = vpop.eup %2151  ;;  %v1511_v13 = vadd.f32 1.0, %v2150_v12  ;;  %v1882_v12 = vld [vmem:[#allocation7 + $0x50] sm:$0xff] }
 0x62b   :  { %2155 = vrcp.f32 %v1510_v6  ;;  %v1883_v6 = vld [vmem:[#allocation7 + $0x58] sm:$0xff] }
 0x62c   :  { %2157 = vrcp.f32 %v1511_v13  ;;  %v1877_v13 = vld [vmem:[#allocation7 + $0x28] sm:$0xff] }
 0x636   :  { %v2154_v14 = vpop.eup %2153 }
 0x637   :  { %v1520_v8 = vmul.f32 %v2154_v14, %v2152_v29  ;;  %v1881_v29 = vld [vmem:[#allocation7 + $0x48] sm:$0xff]  ;;  %v1880_v14 = vld [vmem:[#allocation7 + $0x40] sm:$0xff] }
 0x638   :  { %v2156_v7 = vpop.eup %2155 }
 0x639   :  { %v1519_v51 = vmul.f32 %v2156_v7, %v3197_v62  ;;  %v2158_v49 = vpop.eup %2157  ;;  %v1878_v7 = vld [vmem:[#allocation7 + $0x30] sm:$0xff] }
 0x63b   :  { %v3271_v2 = vadd.f32 %v1520_v8, %v1519_v51  ;;  %v1879_v8 = vld [vmem:[#allocation7 + $0x38] sm:$0xff]  ;;  %v1876_v51 = vld [vmem:[#allocation7 + $0x20] sm:$0xff] }
 0x63d   :  { %2159 = vtanh.f32 %v3271_v2 }
 0x64a   :  { %v2160_v48 = vpop.eup %2159 }
 0x64b   :  { %v1523_v23 = vmul.f32 %v2160_v48, %v2158_v49  ;;  %v1874_v49 = vld [vmem:[#allocation7 + $0x10] sm:$0xff]  ;;  %v1873_v48 = vld [vmem:[#allocation7 + $0x8] sm:$0xff] }
 0x64d   :  { %1593 = vmatmul.mubr.f32.vlgmr.msra.gmra.mxu0 %v1523_v23  ;;  %1664 = vmatmul.mubr.f32.vlgmr.msra.gmra.mxu1 %v1523_v23  ;;  %v1872_v23 = vld [vmem:[#allocation7] sm:$0xff] }
 0x64e   :  { %1703 = vmatpush1.msra.mxu0 %v2928_v1  ;;  %1774 = vmatpush1.msra.mxu1 %v2931_v59  ;;  %v3625_v1 = vld [vmem:[#allocation11_spill] sm:$0xff]  ;;  %v3626_v59 = vld [vmem:[#allocation32_spill] sm:$0xff] }
 0x64f   :  { %1704 = vmatprep.subr.mxu0 %v2934_v20  ;;  %1775 = vmatprep.subr.mxu1 %v2937_v57  ;;  %v3627_v20 = vld [vmem:[#allocation34_spill] sm:$0xff]  ;;  %v3628_v57 = vld [vmem:[#allocation33_spill] sm:$0xff] }
 0x650   :  { %1705 = vmatpush1.msra.mxu0 %v2940_v58  ;;  %1776 = vmatpush1.msra.mxu1 %v2943_v56  ;;  %v3629_v58 = vld [vmem:[#allocation35_spill] sm:$0xff] }
 0x651   :  { %1706 = vmatprep.subr.mxu0 %v2946_v53  ;;  %1777 = vmatprep.subr.mxu1 %v2949_v61  ;;  %v3630_v56 = vld [vmem:[#allocation15_spill] sm:$0xff]  ;;  %v3631_v53 = vld [vmem:[#allocation16_spill] sm:$0xff]  ;;  %v3632_v61 = vld [vmem:[#allocation17_spill] sm:$0xff] }
 0x652   :  { %1707 = vmatpush1.msra.mxu0 %v2952_v52  ;;  %1778 = vmatpush1.msra.mxu1 %v2955_v4  ;;  %v3633_v52 = vld [vmem:[#allocation18_spill] sm:$0xff]  ;;  %v3634_v4 = vld [vmem:[#allocation19_spill] sm:$0xff] }
 0x653   :  { %1708 = vmatprep.subr.mxu0 %v2958_v38  ;;  %1779 = vmatprep.subr.mxu1 %v2961_v11  ;;  %v3635_v38 = vld [vmem:[#allocation20_spill] sm:$0xff]  ;;  %v3636_v11 = vld [vmem:[#allocation21_spill] sm:$0xff] }
 0x654   :  { %1709 = vmatpush1.msra.mxu0 %v2964_v63  ;;  %1780 = vmatpush1.msra.mxu1 %v2967_v3  ;;  %v3637_v63 = vld [vmem:[#allocation22_spill] sm:$0xff]  ;;  %v3638_v3 = vld [vmem:[#allocation23_spill] sm:$0xff] }
 0x655   :  { %1710 = vmatprep.subr.mxu0 %v2970_v54  ;;  %1781 = vmatprep.subr.mxu1 %v2973_v27  ;;  %v3639_v54 = vld [vmem:[#allocation24_spill] sm:$0xff]  ;;  %v3640_v27 = vld [vmem:[#allocation25_spill] sm:$0xff] }
 0x656   :  { %1711 = vmatpush1.msra.mxu0 %v3578_v15  ;;  %1782 = vmatpush1.msra.mxu1 %v3579_v16  ;;  %v3644_v16 = vld [vmem:[#allocation54_spill] sm:$0xff] }
 0x657   :  { %1712 = vmatprep.subr.mxu0 %v2982_v31  ;;  %1783 = vmatprep.subr.mxu1 %v2985_v47  ;;  %v3643_v47 = vld [vmem:[#allocation52_spill] sm:$0xff] }
 0x658   :  { %1713 = vmatpush1.msra.mxu0 %v2988_v0  ;;  %1784 = vmatpush1.msra.mxu1 %v2991_v60 }
 0x659   :  { %1714 = vmatprep.subr.mxu0 %v2994_v28  ;;  %1785 = vmatprep.subr.mxu1 %v2997_v30  ;;  %v3641_v28 = vmov 0.0   ;;  %v3642_v30 = vld [vmem:[#allocation26_spill] sm:$0xff] }
 0x65a   :  { %1715 = vmatpush1.msra.mxu0 %v3074_v17  ;;  %1786 = vmatpush1.msra.mxu1 %v3077_v18 }
 0x65b   :  { %1716 = vmatprep.subr.mxu0 %v3080_v19  ;;  %1787 = vmatprep.subr.mxu1 %v3083_v21  ;;  %v3645_v21 = vld [vmem:[#allocation53_spill] sm:$0xff] }
 0x65c   :  { %1717 = vmatpush1.msra.mxu0 %v3086_v22  ;;  %1788 = vmatpush1.msra.mxu1 %v3089_v24 }
 0x65d   :  { %1718 = vmatprep.subr.mxu0 %v3092_v55  ;;  %1789 = vmatprep.subr.mxu1 %v3095_v32  ;;  %v3646_v32 = vld [vmem:[#allocation55_spill] sm:$0xff] }
 0x65e   :  { %1719 = vmatpush1.msra.mxu0 %v3098_v33  ;;  %1790 = vmatpush1.msra.mxu1 %v3101_v34 }
 0x65f   :  { %1720 = vmatprep.subr.mxu0 %v3104_v35  ;;  %1791 = vmatprep.subr.mxu1 %v3107_v36 }
 0x660   :  { %1721 = vmatpush1.msra.mxu0 %v3110_v37  ;;  %1792 = vmatpush1.msra.mxu1 %v3113_v39 }
 0x661   :  { %1722 = vmatprep.subr.mxu0 %v3116_v40  ;;  %1793 = vmatprep.subr.mxu1 %v3119_v41 }
 0x662   :  { %1723 = vmatpush1.msra.mxu0 %v3122_v42  ;;  %1794 = vmatpush1.msra.mxu1 %v3125_v43 }
 0x663   :  { %1724 = vmatprep.subr.mxu0 %v3128_v44  ;;  %1795 = vmatprep.subr.mxu1 %v3131_v45 }
 0x664   :  { %1725 = vmatpush1.msra.mxu0 %v3134_v46  ;;  %1796 = vmatpush1.msra.mxu1 %v3625_v1 }
 0x665   :  { %1726 = vmatprep.subr.mxu0 %v3626_v59  ;;  %1797 = vmatprep.subr.mxu1 %v3627_v20  ;;  %v3647_v59 = vld [vmem:[#allocation56_spill] sm:$0xff] }
 0x666   :  { %1727 = vmatpush1.msra.mxu0 %v3628_v57  ;;  %1798 = vmatpush1.msra.mxu1 %v3629_v58 }
 0x667   :  { %1728 = vmatprep.subr.mxu0 %v3630_v56  ;;  %1799 = vmatprep.subr.mxu1 %v3631_v53  ;;  %v3648_v56 = vld [vmem:[#allocation58_spill] sm:$0xff] }
 0x668   :  { %1729 = vmatpush1.msra.mxu0 %v3632_v61  ;;  %1800 = vmatpush1.msra.mxu1 %v3633_v52 }
 0x669   :  { %1730 = vmatprep.subr.mxu0 %v3634_v4  ;;  %1801 = vmatprep.subr.mxu1 %v3635_v38  ;;  %v3649_v4 = vld [vmem:[#allocation57_spill] sm:$0xff] }
 0x66a   :  { %1731 = vmatpush1.msra.mxu0 %v3636_v11  ;;  %1802 = vmatpush1.msra.mxu1 %v3637_v63 }
 0x66b   :  { %1732 = vmatprep.subr.mxu0 %v3638_v3  ;;  %1803 = vmatprep.subr.mxu1 %v3639_v54  ;;  %v3650_v3 = vld [vmem:[#allocation59_spill] sm:$0xff] }
 0x66c   :  { %1733 = vmatpush1.msra.mxu0 %v3640_v27  ;;  %1766 = vmatprep.mubr.f32.mxu0 %v3641_v28 }
 0x66d   :  { %1804 = vmatpush1.msra.mxu1 %v3642_v30  ;;  %1837 = vmatprep.mubr.f32.mxu1 %v3641_v28 }
 0x66e   :  { %2021 = vmatprep.subr.mxu0 %v3641_v28 }
 0x70d   :  { %v1594_v31 = vpop.f32.mrf.mxu0  ;;  %v1665_v19 = vpop.f32.mrf.mxu1 }
 0x70e   :  { %v1670_v0 = vadd.f32 %v1594_v31, %v3643_v47  ;;  %v1672_v22 = vadd.f32 %v1665_v19, %v3645_v21 }
 0x70f   :  { %v1596_v60 = vpop.f32.mrf.mxu0  ;;  %v1667_v24 = vpop.f32.mrf.mxu1 }
 0x710   :  { %v1996_v15 = vmul.f32 -1.442695, %v1670_v0  ;;  %v1671_v17 = vadd.f32 %v1596_v60, %v3644_v16  ;;  %v1998_v55 = vmul.f32 -1.442695, %v1672_v22  ;;  %v1673_v33 = vadd.f32 %v1667_v24, %v3646_v32 }
 0x712   :  { %2161 = vpow2.f32 %v1996_v15  ;;  %v1997_v18 = vmul.f32 -1.442695, %v1671_v17 }
 0x714   :  { %2163 = vpow2.f32 %v1997_v18 }
 0x715   :  { %2165 = vpow2.f32 %v1998_v55  ;;  %v2002_v55 = vld [vmem:[%s3379_s5] ss:$0 sm:$0xff] }
 0x716   :  { %2167 = vtanh.f32 %v1673_v33 }
 0x71f   :  { %v2162_v34 = vpop.eup %2161 }
 0x720   :  { %v1683_v35 = vadd.f32 1.0, %v2162_v34 }
 0x721   :  { %v2164_v36 = vpop.eup %2163 }
 0x722   :  { %2169 = vrcp.f32 %v1683_v35  ;;  %v1684_v37 = vadd.f32 1.0, %v2164_v36  ;;  %v2166_v39 = vpop.eup %2165 }
 0x723   :  { %v2168_v40 = vpop.eup %2167  ;;  %v1685_v44 = vadd.f32 1.0, %v2166_v39 }
 0x724   :  { %2171 = vrcp.f32 %v1684_v37 }
 0x725   :  { %2173 = vrcp.f32 %v1685_v44 }
 0x72f   :  { %v2170_v41 = vpop.eup %2169 }
 0x730   :  { %v1694_v42 = vmul.f32 %v2170_v41, %v2168_v40 }
 0x731   :  { %v2172_v43 = vpop.eup %2171 }
 0x732   :  { %v1693_v45 = vmul.f32 %v2172_v43, %v3271_v2  ;;  %v2174_v62 = vpop.eup %2173  ;;  %v1875_v2 = vld [vmem:[#allocation7 + $0x18] sm:$0xff] }
 0x734   :  { %v3344_v46 = vadd.f32 %v1694_v42, %v1693_v45 }
 0x736   :  { %2175 = vtanh.f32 %v3344_v46 }
 0x743   :  { %v2176_v26 = vpop.eup %2175 }
 0x744   :  { %v1697_v10 = vmul.f32 %v2176_v26, %v2174_v62 }
 0x746   :  { %1767 = vmatmul.mubr.f32.vlgmr.msra.gmra.mxu0 %v1697_v10  ;;  %1838 = vmatmul.mubr.f32.vlgmr.msra.gmra.mxu1 %v1697_v10 }
 0x747   :  { %2022 = vmatpush3.msra.mxu0 %v1887_v25  ;;  %2053 = vmatprep.mubr.msk.f32.mxu0 %vm2333_vm0, %v3641_v28 }
 0x748   :  { %2023 = vmatprep.subr.mxu0 %v3641_v28 }
 0x749   :  { %2024 = vmatpush3.msra.mxu0 %v1886_v50 }
 0x74a   :  { %2025 = vmatprep.subr.mxu0 %v3641_v28 }
 0x74b   :  { %2026 = vmatpush3.msra.mxu0 %v1885_v9 }
 0x74c   :  { %2027 = vmatprep.subr.mxu0 %v3641_v28 }
 0x74d   :  { %2028 = vmatpush3.msra.mxu0 %v1884_v5 }
 0x74e   :  { %2029 = vmatprep.subr.mxu0 %v3641_v28 }
 0x74f   :  { %2030 = vmatpush3.msra.mxu0 %v1883_v6 }
 0x750   :  { %2031 = vmatprep.subr.mxu0 %v3641_v28 }
 0x751   :  { %2032 = vmatpush3.msra.mxu0 %v1882_v12 }
 0x752   :  { %2033 = vmatprep.subr.mxu0 %v3641_v28 }
 0x753   :  { %2034 = vmatpush3.msra.mxu0 %v1881_v29 }
 0x754   :  { %2035 = vmatprep.subr.mxu0 %v3641_v28 }
 0x755   :  { %2036 = vmatpush3.msra.mxu0 %v1880_v14 }
 0x756   :  { %2037 = vmatprep.subr.mxu0 %v3641_v28 }
 0x757   :  { %2038 = vmatpush3.msra.mxu0 %v1879_v8 }
 0x758   :  { %2039 = vmatprep.subr.mxu0 %v3641_v28 }
 0x759   :  { %2040 = vmatpush3.msra.mxu0 %v1878_v7 }
 0x75a   :  { %2041 = vmatprep.subr.mxu0 %v3641_v28 }
 0x75b   :  { %2042 = vmatpush3.msra.mxu0 %v1877_v13 }
 0x75c   :  { %2043 = vmatprep.subr.mxu0 %v3641_v28 }
 0x75d   :  { %2044 = vmatpush3.msra.mxu0 %v1876_v51 }
 0x75e   :  { %2045 = vmatprep.subr.mxu0 %v3641_v28 }
 0x75f   :  { %2046 = vmatpush3.msra.mxu0 %v1875_v2 }
 0x760   :  { %2047 = vmatprep.subr.mxu0 %v3641_v28 }
 0x761   :  { %2048 = vmatpush3.msra.mxu0 %v1874_v49 }
 0x762   :  { %2049 = vmatprep.subr.mxu0 %v3641_v28 }
 0x763   :  { %2050 = vmatpush3.msra.mxu0 %v1873_v48 }
 0x764   :  { %2051 = vmatprep.subr.mxu0 %v3641_v28 }
 0x765   :  { %2052 = vmatpush3.msra.mxu0 %v1872_v23 }
 0x806   :  { %v1768_v1 = vpop.f32.mrf.mxu0  ;;  %v1839_v52 = vpop.f32.mrf.mxu1 }
 0x807   :  { %v1844_v20 = vadd.f32 %v1768_v1, %v3647_v59  ;;  %v1846_v38 = vadd.f32 %v1839_v52, %v3649_v4 }
 0x808   :  { %v1770_v57 = vpop.f32.mrf.mxu0  ;;  %v1841_v11 = vpop.f32.mrf.mxu1 }
 0x809   :  { %v1999_v58 = vmul.f32 -1.442695, %v1844_v20  ;;  %v1845_v53 = vadd.f32 %v1770_v57, %v3648_v56  ;;  %v2001_v63 = vmul.f32 -1.442695, %v1846_v38  ;;  %v1847_v54 = vadd.f32 %v1841_v11, %v3650_v3 }
 0x80b   :  { %2177 = vpow2.f32 %v1999_v58  ;;  %v2000_v61 = vmul.f32 -1.442695, %v1845_v53 }
 0x80d   :  { %2179 = vpow2.f32 %v2000_v61 }
 0x80e   :  { %2181 = vpow2.f32 %v2001_v63 }
 0x80f   :  { %2183 = vtanh.f32 %v1847_v54 }
 0x818   :  { %v2178_v27 = vpop.eup %2177 }
 0x819   :  { %v1857_v28 = vadd.f32 1.0, %v2178_v27 }
 0x81a   :  { %v2180_v30 = vpop.eup %2179 }
 0x81b   :  { %2185 = vrcp.f32 %v1857_v28  ;;  %v1858_v31 = vadd.f32 1.0, %v2180_v30  ;;  %v2182_v47 = vpop.eup %2181 }
 0x81c   :  { %v2184_v0 = vpop.eup %2183  ;;  %v1859_v17 = vadd.f32 1.0, %v2182_v47 }
 0x81d   :  { %2187 = vrcp.f32 %v1858_v31 }
 0x81e   :  { %2189 = vrcp.f32 %v1859_v17 }
 0x828   :  { %v2186_v60 = vpop.eup %2185 }
 0x829   :  { %v1868_v15 = vmul.f32 %v2186_v60, %v2184_v0 }
 0x82a   :  { %v2188_v16 = vpop.eup %2187 }
 0x82b   :  { %v1867_v18 = vmul.f32 %v2188_v16, %v3344_v46  ;;  %v2190_v21 = vpop.eup %2189 }
 0x82d   :  { %v1869_v19 = vadd.f32 %v1868_v15, %v1867_v18 }
 0x82f   :  { %2191 = vtanh.f32 %v1869_v19 }
 0x83c   :  { %v2192_v22 = vpop.eup %2191 }
 0x83d   :  { %v1871_v24 = vmul.f32 %v2192_v22, %v2190_v21 }
 0x83f   :  { %2054 = vmatmul.mubr.f32.vlgmr.msra.gmra.mxu0 %v1871_v24 }
 0x8ff   :  { %v1961_v32 = vpop.f32.mrf.mxu0 }
 0x900   :  { %v1962_v33 = vadd.f32 %v2002_v55, %v1961_v32 }
 0x901   :  { %v2055_v34 = vpop.f32.mrf.mxu0 }
 0x902   :  { %v2003_v35 = vmul.f32 -1.442695, %v1962_v33 }
 0x904   :  { %2193 = vpow2.f32 %v2003_v35 }
 0x911   :  { %v2194_v36 = vpop.eup %2193 }
 0x912   :  { %v1968_v37 = vadd.f32 1.0, %v2194_v36 }
 0x914   :  { %2195 = vrcp.f32 %v1968_v37 }
 0x921   :  { %v2196_v39 = vpop.eup %2195 }
 0x922   :  { %1971 = vst [vmem:[%s3380_s6] sm:$0xff] %v2196_v39 }
 0x923   :  { %1976 = vsyncpa [#allocation4], 1 }
 0x924   :  { %1977 = vsyncpa [#allocation6], 1 }

</bundles_post_ra>
